<compile_context>
chip_gen: v7x
topology: tpu7x:2x2x1
jax: 0.10.0
libtpu: 0.0.40
codegen_flags: <defaults>
</compile_context>

<pallas_src>
import numpy as np
import jax
import jax.numpy as jnp
from jax import lax
from jax.experimental import pallas as pl
from jax.experimental.pallas import tpu as pltpu


# Small VGG-style backbone (base_network.VGG): conv3x3+ReLU blocks + 2x2 max pools.
_VGG_CFG = [(3, 8), (8, 8), "M", (8, 16), (16, 16), "M", (16, 32), (32, 32), "M"]


def _build_plan(cfg, h0, w0, c0):
    """Static per-layer descriptors (all Python ints)."""
    layers = []
    H, W, C = h0, w0, c0
    compact = True            # is the upcoming layer's input lane layout compact?
    for item in cfg:
        if item == "M":
            layers.append(dict(kind="pool", H=H, W=W, C=C, in_lanes=W * C))
            H, W = H // 2, W // 2
            compact = False   # pool defers width decimation to the next conv
        else:
            cin, cout = item
            assert cin == C
            stride_in = cin if compact else 2 * cin
            layers.append(dict(kind="conv", H=H, W=W, Cin=cin, Cout=cout,
                               compact_in=compact,
                               in_lanes=W * stride_in, out_lanes=W * cout))
            C = cout
            compact = True
    return layers, (H, W, C)


def _banded_weight(w, W, compact_in):
    """(3,3,Cin,Cout) conv kernel -> (3, in_lanes, W*Cout) banded matrices.

    Row layout matches the in-kernel activation lanes (physical lane
    wi*stride + ci; stride = Cin for a compact input, 2*Cin for the uncompacted
    layout right after a pool whose odd width positions carry discarded data).
    kw taps and SAME zero padding at the left/right edges are folded in.
    """
    Cin, Cout = w.shape[2], w.shape[3]
    sel = np.zeros((W, 3, W), np.float32)            # sel[wi, kw, wo]
    for wo in range(W):
        for kw in range(3):
            wi = wo + kw - 1
            if 0 <= wi < W:
                sel[wi, kw, wo] = 1.0
    band = jnp.einsum("ukv,hkcd->hucvd", jnp.asarray(sel), w.astype(jnp.float32))
    if not compact_in:                               # zero rows for odd width slots
        band = jnp.pad(band, ((0, 0), (0, 0), (0, Cin), (0, 0), (0, 0)))
    return band.reshape(3, -1, W * Cout)             # (3, in_lanes, out_lanes)


def _make_kernel(layers, B):
    n_conv = sum(1 for l in layers if l["kind"] == "conv")

    def kernel(*refs):
        it = iter(refs)
        x_ref = next(it)                                     # (B, H0, W0*C0)
        wbs = [(next(it), next(it)) for _ in range(n_conv)]  # (3,K,N), (1,N) each
        o_ref = next(it)                                     # (B, Ho, out_lanes)
        bufs = list(it)                                      # one scratch per layer

        # Re-zero only the (B+1) padding rows of each conv input slab (top row +
        # one shared gap row after every image).  Image rows are fully
        # overwritten below, so nothing else needs initialization.
        for li, layer in enumerate(layers):
            if layer["kind"] != "conv":
                continue
            z = jnp.zeros((1, layer["in_lanes"]), jnp.float32)
            bufs[li][0:1, :] = z
            for i in range(B):
                r = (i + 1) * (layer["H"] + 1)
                bufs[li][r:r + 1, :] = z

        def stage(dst_li, i, val):
            """Deliver image i's rows to the input slab of layer dst_li."""
            if dst_li == len(layers):                        # network output
                o_ref[i] = val.astype(o_ref.dtype)
            elif layers[dst_li]["kind"] == "conv":
                H = layers[dst_li]["H"]
                base = 1 + i * (H + 1)                       # skip per-image gap row
                bufs[dst_li][base:base + H, :] = val
            else:                                            # pool input (no gaps)
                H = layers[dst_li]["H"]
                bufs[dst_li][i * H:(i + 1) * H, :] = val

        for i in range(B):                                   # stage network input
            stage(0, i, x_ref[i].astype(jnp.float32))

        ci = 0
        for li, layer in enumerate(layers):
            buf = bufs[li]
            H = layer["H"]
            if layer["kind"] == "conv":
                w_ref, b_ref = wbs[ci]
                ci += 1
                M = B * (H + 1) - 1                          # all images + gap rows
                # 3 row-shifted slices, one banded matmul each (kw folded into W).
                acc = jnp.dot(buf[0:M, :], w_ref[0],
                              preferred_element_type=jnp.float32)
                for kh in (1, 2):
                    acc = acc + jnp.dot(buf[kh:kh + M, :], w_ref[kh],
                                        preferred_element_type=jnp.float32)
                out = jnp.maximum(acc + b_ref[...], 0.0)     # bias + ReLU, whole slab
                for i in range(B):                           # drop gap rows
                    stage(li + 1, i, out[i * (H + 1):i * (H + 1) + H, :])
            else:                                            # 2x2 / stride-2 max pool
                C = layer["C"]
                lanes = layer["in_lanes"]                    # = W * C (compact)
                Hh = H // 2
                for i in range(B):
                    ev = buf[pl.ds(i * H, Hh, 2), :]         # rows 2h
                    od = buf[pl.ds(i * H + 1, Hh, 2), :]     # rows 2h+1
                    rmax = jnp.maximum(ev, od)
                    # Lane-pair max: bring width position w+1 onto w (XLU roll);
                    # odd width positions now hold garbage that the next conv's
                    # zeroed weight rows (or the wrapper) discard.
                    lmax = jnp.maximum(
                        rmax, pltpu.roll(rmax, shift=lanes - C, axis=1))
                    stage(li + 1, i, lmax)

    return kernel


def encoder_forward(params, x_nchw):
    """encoder.forward: y = VGG(x); return y[-1] (NCHW)."""
    N, C0, H0, W0 = x_nchw.shape
    layers, (Ho, Wo, Co) = _build_plan(_VGG_CFG, H0, W0, C0)

    # Batch block: fold as many images as possible into one grid step (bigger M,
    # amortized per-step overhead).  The cap of 8 keeps multiple grid steps for
    # larger N so v7x's two TensorCores both get work.
    B = min(N, 8)
    while N % B:
        B -= 1

    # NCHW -> (N, H, W*C): rows on sublanes, width*channels on lanes.
    x_rows = jnp.transpose(x_nchw, (0, 2, 3, 1)).reshape(N, H0, W0 * C0)
    x_rows = x_rows.astype(jnp.float32)

    inputs = [x_rows]
    in_specs = [pl.BlockSpec((B, H0, W0 * C0), lambda n: (n, 0, 0))]

    pi = 0
    for layer in layers:
        if layer["kind"] != "conv":
            continue
        w, b = params[pi]
        pi += 1
        wmat = _banded_weight(w, layer["W"], layer["compact_in"])
        brow = jnp.tile(b.astype(jnp.float32), layer["W"])[None, :]
        inputs += [wmat, brow]
        in_specs += [pl.BlockSpec(wmat.shape, lambda n: (0, 0, 0)),
                     pl.BlockSpec(brow.shape, lambda n: (0, 0))]

    # One VMEM slab per layer; activations never leave VMEM.
    scratch = []
    for layer in layers:
        if layer["kind"] == "conv":
            rows = B * (layer["H"] + 1) + 1       # images + shared zero gap rows
        else:
            rows = B * layer["H"]                 # pool input, no gaps needed
        scratch.append(pltpu.VMEM((rows, layer["in_lanes"]), jnp.float32))

    out_lanes = 2 * Wo * Co                       # last pool output, uncompacted (=128)
    out_raw = pl.pallas_call(
        _make_kernel(layers, B),
        out_shape=jax.ShapeDtypeStruct((N, Ho, out_lanes), jnp.float32),
        grid_spec=pltpu.PrefetchScalarGridSpec(
            num_scalar_prefetch=0,
            grid=(N // B,),
            in_specs=in_specs,
            out_specs=pl.BlockSpec((B, Ho, out_lanes), lambda n: (n, 0, 0)),
            scratch_shapes=scratch,
        ),
        compiler_params=pltpu.CompilerParams(
            dimension_semantics=("parallel",)),
    )(*inputs)

    # Drop the discarded odd width positions of the final pool, then go to NCHW.
    out = out_raw.reshape(N, Ho, 2 * Wo, Co)[:, :, ::2, :]
    return jnp.transpose(out, (0, 3, 1, 2))


def init_vgg_params(key):
    params = []
    for item in _VGG_CFG:
        if item == "M":
            continue
        cin, cout = item
        key, kw, kb = jax.random.split(key, 3)
        w = jax.random.normal(kw, (3, 3, cin, cout), jnp.float32) / jnp.sqrt(9.0 * cin)
        b = 0.01 * jax.random.normal(kb, (cout,), jnp.float32)
        params.append((w, b))
    return params


# ---------------------------------------------------------------------------
# plain-JAX reference for correctness check
# ---------------------------------------------------------------------------
def _reference_forward(params, x_nchw):
    x = x_nchw.astype(jnp.float32)
    pi = 0
    for item in _VGG_CFG:
        if item == "M":
            x = lax.reduce_window(x, -jnp.inf, lax.max,
                                  (1, 1, 2, 2), (1, 1, 2, 2), "VALID")
        else:
            w, b = params[pi]
            pi += 1
            w_oihw = jnp.transpose(w, (3, 2, 0, 1))
            x = lax.conv_general_dilated(
                x, w_oihw, (1, 1), "SAME",
                dimension_numbers=("NCHW", "OIHW", "NCHW"))
            x = jnp.maximum(x + b[None, :, None, None], 0.0)
    return x


if __name__ == "__main__":
    key = jax.random.PRNGKey(0)
    kp, kx = jax.random.split(key)
    params = init_vgg_params(kp)

    # NCHW input, matching the PyTorch module's convention.
    x = jax.random.normal(kx, (2, 3, 16, 16), jnp.float32)

    fwd = jax.jit(encoder_forward)
    y = jax.block_until_ready(fwd(params, x))
    assert y.shape == (2, 32, 2, 2), y.shape

    y_ref = jax.block_until_ready(_reference_forward(params, x))
    err = float(jnp.max(jnp.abs(y - y_ref)))
    assert jnp.allclose(y, y_ref, rtol=1e-3, atol=1e-3), err

    print("KERNEL_OK")
</pallas_src>

<mosaic_0001>
module attributes {stable_mosaic.version = 11 : i64} {
  func.func @kernel(%arg0: i32, %arg1: memref<2x16x48xf32, #tpu.memory_space<vmem>>, %arg2: memref<3x48x128xf32, #tpu.memory_space<vmem>>, %arg3: memref<1x128xf32, #tpu.memory_space<vmem>>, %arg4: memref<3x128x128xf32, #tpu.memory_space<vmem>>, %arg5: memref<1x128xf32, #tpu.memory_space<vmem>>, %arg6: memref<3x128x128xf32, #tpu.memory_space<vmem>>, %arg7: memref<1x128xf32, #tpu.memory_space<vmem>>, %arg8: memref<3x128x128xf32, #tpu.memory_space<vmem>>, %arg9: memref<1x128xf32, #tpu.memory_space<vmem>>, %arg10: memref<3x128x128xf32, #tpu.memory_space<vmem>>, %arg11: memref<1x128xf32, #tpu.memory_space<vmem>>, %arg12: memref<3x128x128xf32, #tpu.memory_space<vmem>>, %arg13: memref<1x128xf32, #tpu.memory_space<vmem>>, %arg14: memref<2x2x128xf32, #tpu.memory_space<vmem>>, %arg15: memref<35x48xf32, #tpu.memory_space<vmem>>, %arg16: memref<35x128xf32, #tpu.memory_space<vmem>>, %arg17: memref<32x128xf32, #tpu.memory_space<vmem>>, %arg18: memref<19x128xf32, #tpu.memory_space<vmem>>, %arg19: memref<19x128xf32, #tpu.memory_space<vmem>>, %arg20: memref<16x128xf32, #tpu.memory_space<vmem>>, %arg21: memref<11x128xf32, #tpu.memory_space<vmem>>, %arg22: memref<11x128xf32, #tpu.memory_space<vmem>>, %arg23: memref<8x128xf32, #tpu.memory_space<vmem>>) attributes {dimension_semantics = [#tpu.dimension_semantics<parallel>], iteration_bounds = array<i64: 1>, scalar_prefetch = 0 : i64, scratch_operands = 9 : i64, tpu.core_type = #tpu.core_type<tc>, window_params = [{transform_indices = @transform_0, window_bounds = array<i64: 2, 16, 48>}, {pipeline_mode = #tpu.pipeline_mode<synchronous>, transform_indices = @transform_1, window_bounds = array<i64: 3, 48, 128>}, {pipeline_mode = #tpu.pipeline_mode<synchronous>, transform_indices = @transform_2, window_bounds = array<i64: 1, 128>}, {pipeline_mode = #tpu.pipeline_mode<synchronous>, transform_indices = @transform_3, window_bounds = array<i64: 3, 128, 128>}, {pipeline_mode = #tpu.pipeline_mode<synchronous>, transform_indices = @transform_4, window_bounds = array<i64: 1, 128>}, {pipeline_mode = #tpu.pipeline_mode<synchronous>, transform_indices = @transform_5, window_bounds = array<i64: 3, 128, 128>}, {pipeline_mode = #tpu.pipeline_mode<synchronous>, transform_indices = @transform_6, window_bounds = array<i64: 1, 128>}, {pipeline_mode = #tpu.pipeline_mode<synchronous>, transform_indices = @transform_7, window_bounds = array<i64: 3, 128, 128>}, {pipeline_mode = #tpu.pipeline_mode<synchronous>, transform_indices = @transform_8, window_bounds = array<i64: 1, 128>}, {pipeline_mode = #tpu.pipeline_mode<synchronous>, transform_indices = @transform_9, window_bounds = array<i64: 3, 128, 128>}, {pipeline_mode = #tpu.pipeline_mode<synchronous>, transform_indices = @transform_10, window_bounds = array<i64: 1, 128>}, {pipeline_mode = #tpu.pipeline_mode<synchronous>, transform_indices = @transform_11, window_bounds = array<i64: 3, 128, 128>}, {pipeline_mode = #tpu.pipeline_mode<synchronous>, transform_indices = @transform_12, window_bounds = array<i64: 1, 128>}, {transform_indices = @transform_13, window_bounds = array<i64: 2, 2, 128>}]} {
    %cst = arith.constant 0.000000e+00 : f32
    %0 = vector.broadcast %cst : f32 to vector<1x48xf32>
    %c0 = arith.constant 0 : index
    %c0_0 = arith.constant 0 : index
    %1 = vector.load %arg15[%c0, %c0_0] : memref<35x48xf32, #tpu.memory_space<vmem>>, vector<1x48xf32>
    tpu.vector_store %arg15[%c0, %c0_0], %0 {strides = array<i32>} : memref<35x48xf32, #tpu.memory_space<vmem>>, vector<1x48xf32>,
    %c17 = arith.constant 17 : index
    %c0_1 = arith.constant 0 : index
    %2 = vector.load %arg15[%c17, %c0_1] : memref<35x48xf32, #tpu.memory_space<vmem>>, vector<1x48xf32>
    tpu.vector_store %arg15[%c17, %c0_1], %0 {strides = array<i32>} : memref<35x48xf32, #tpu.memory_space<vmem>>, vector<1x48xf32>,
    %c34 = arith.constant 34 : index
    %c0_2 = arith.constant 0 : index
    %3 = vector.load %arg15[%c34, %c0_2] : memref<35x48xf32, #tpu.memory_space<vmem>>, vector<1x48xf32>
    tpu.vector_store %arg15[%c34, %c0_2], %0 {strides = array<i32>} : memref<35x48xf32, #tpu.memory_space<vmem>>, vector<1x48xf32>,
    %cst_3 = arith.constant 0.000000e+00 : f32
    %4 = vector.broadcast %cst_3 : f32 to vector<1x128xf32>
    %c0_4 = arith.constant 0 : index
    %c0_5 = arith.constant 0 : index
    %5 = vector.load %arg16[%c0_4, %c0_5] : memref<35x128xf32, #tpu.memory_space<vmem>>, vector<1x128xf32>
    tpu.vector_store %arg16[%c0_4, %c0_5], %4 {strides = array<i32>} : memref<35x128xf32, #tpu.memory_space<vmem>>, vector<1x128xf32>,
    %c17_6 = arith.constant 17 : index
    %c0_7 = arith.constant 0 : index
    %6 = vector.load %arg16[%c17_6, %c0_7] : memref<35x128xf32, #tpu.memory_space<vmem>>, vector<1x128xf32>
    tpu.vector_store %arg16[%c17_6, %c0_7], %4 {strides = array<i32>} : memref<35x128xf32, #tpu.memory_space<vmem>>, vector<1x128xf32>,
    %c34_8 = arith.constant 34 : index
    %c0_9 = arith.constant 0 : index
    %7 = vector.load %arg16[%c34_8, %c0_9] : memref<35x128xf32, #tpu.memory_space<vmem>>, vector<1x128xf32>
    tpu.vector_store %arg16[%c34_8, %c0_9], %4 {strides = array<i32>} : memref<35x128xf32, #tpu.memory_space<vmem>>, vector<1x128xf32>,
    %cst_10 = arith.constant 0.000000e+00 : f32
    %8 = vector.broadcast %cst_10 : f32 to vector<1x128xf32>
    %c0_11 = arith.constant 0 : index
    %c0_12 = arith.constant 0 : index
    %9 = vector.load %arg18[%c0_11, %c0_12] : memref<19x128xf32, #tpu.memory_space<vmem>>, vector<1x128xf32>
    tpu.vector_store %arg18[%c0_11, %c0_12], %8 {strides = array<i32>} : memref<19x128xf32, #tpu.memory_space<vmem>>, vector<1x128xf32>,
    %c9 = arith.constant 9 : index
    %c0_13 = arith.constant 0 : index
    %10 = vector.load %arg18[%c9, %c0_13] : memref<19x128xf32, #tpu.memory_space<vmem>>, vector<1x128xf32>
    tpu.vector_store %arg18[%c9, %c0_13], %8 {strides = array<i32>} : memref<19x128xf32, #tpu.memory_space<vmem>>, vector<1x128xf32>,
    %c18 = arith.constant 18 : index
    %c0_14 = arith.constant 0 : index
    %11 = vector.load %arg18[%c18, %c0_14] : memref<19x128xf32, #tpu.memory_space<vmem>>, vector<1x128xf32>
    tpu.vector_store %arg18[%c18, %c0_14], %8 {strides = array<i32>} : memref<19x128xf32, #tpu.memory_space<vmem>>, vector<1x128xf32>,
    %cst_15 = arith.constant 0.000000e+00 : f32
    %12 = vector.broadcast %cst_15 : f32 to vector<1x128xf32>
    %c0_16 = arith.constant 0 : index
    %c0_17 = arith.constant 0 : index
    %13 = vector.load %arg19[%c0_16, %c0_17] : memref<19x128xf32, #tpu.memory_space<vmem>>, vector<1x128xf32>
    tpu.vector_store %arg19[%c0_16, %c0_17], %12 {strides = array<i32>} : memref<19x128xf32, #tpu.memory_space<vmem>>, vector<1x128xf32>,
    %c9_18 = arith.constant 9 : index
    %c0_19 = arith.constant 0 : index
    %14 = vector.load %arg19[%c9_18, %c0_19] : memref<19x128xf32, #tpu.memory_space<vmem>>, vector<1x128xf32>
    tpu.vector_store %arg19[%c9_18, %c0_19], %12 {strides = array<i32>} : memref<19x128xf32, #tpu.memory_space<vmem>>, vector<1x128xf32>,
    %c18_20 = arith.constant 18 : index
    %c0_21 = arith.constant 0 : index
    %15 = vector.load %arg19[%c18_20, %c0_21] : memref<19x128xf32, #tpu.memory_space<vmem>>, vector<1x128xf32>
    tpu.vector_store %arg19[%c18_20, %c0_21], %12 {strides = array<i32>} : memref<19x128xf32, #tpu.memory_space<vmem>>, vector<1x128xf32>,
    %cst_22 = arith.constant 0.000000e+00 : f32
    %16 = vector.broadcast %cst_22 : f32 to vector<1x128xf32>
    %c0_23 = arith.constant 0 : index
    %c0_24 = arith.constant 0 : index
    %17 = vector.load %arg21[%c0_23, %c0_24] : memref<11x128xf32, #tpu.memory_space<vmem>>, vector<1x128xf32>
    tpu.vector_store %arg21[%c0_23, %c0_24], %16 {strides = array<i32>} : memref<11x128xf32, #tpu.memory_space<vmem>>, vector<1x128xf32>,
    %c5 = arith.constant 5 : index
    %c0_25 = arith.constant 0 : index
    %18 = vector.load %arg21[%c5, %c0_25] : memref<11x128xf32, #tpu.memory_space<vmem>>, vector<1x128xf32>
    tpu.vector_store %arg21[%c5, %c0_25], %16 {strides = array<i32>} : memref<11x128xf32, #tpu.memory_space<vmem>>, vector<1x128xf32>,
    %c10 = arith.constant 10 : index
    %c0_26 = arith.constant 0 : index
    %19 = vector.load %arg21[%c10, %c0_26] : memref<11x128xf32, #tpu.memory_space<vmem>>, vector<1x128xf32>
    tpu.vector_store %arg21[%c10, %c0_26], %16 {strides = array<i32>} : memref<11x128xf32, #tpu.memory_space<vmem>>, vector<1x128xf32>,
    %cst_27 = arith.constant 0.000000e+00 : f32
    %20 = vector.broadcast %cst_27 : f32 to vector<1x128xf32>
    %c0_28 = arith.constant 0 : index
    %c0_29 = arith.constant 0 : index
    %21 = vector.load %arg22[%c0_28, %c0_29] : memref<11x128xf32, #tpu.memory_space<vmem>>, vector<1x128xf32>
    tpu.vector_store %arg22[%c0_28, %c0_29], %20 {strides = array<i32>} : memref<11x128xf32, #tpu.memory_space<vmem>>, vector<1x128xf32>,
    %c5_30 = arith.constant 5 : index
    %c0_31 = arith.constant 0 : index
    %22 = vector.load %arg22[%c5_30, %c0_31] : memref<11x128xf32, #tpu.memory_space<vmem>>, vector<1x128xf32>
    tpu.vector_store %arg22[%c5_30, %c0_31], %20 {strides = array<i32>} : memref<11x128xf32, #tpu.memory_space<vmem>>, vector<1x128xf32>,
    %c10_32 = arith.constant 10 : index
    %c0_33 = arith.constant 0 : index
    %23 = vector.load %arg22[%c10_32, %c0_33] : memref<11x128xf32, #tpu.memory_space<vmem>>, vector<1x128xf32>
    tpu.vector_store %arg22[%c10_32, %c0_33], %20 {strides = array<i32>} : memref<11x128xf32, #tpu.memory_space<vmem>>, vector<1x128xf32>,
    %c0_34 = arith.constant 0 : index
    %c0_35 = arith.constant 0 : index
    %c0_36 = arith.constant 0 : index
    %24 = vector.load %arg1[%c0_34, %c0_35, %c0_36] : memref<2x16x48xf32, #tpu.memory_space<vmem>>, vector<1x16x48xf32>
    %25 = vector.shape_cast %24 : vector<1x16x48xf32> to vector<16x48xf32>
    %c1 = arith.constant 1 : index
    %c0_37 = arith.constant 0 : index
    %26 = vector.load %arg15[%c1, %c0_37] : memref<35x48xf32, #tpu.memory_space<vmem>>, vector<16x48xf32>
    tpu.vector_store %arg15[%c1, %c0_37], %25 {strides = array<i32>} : memref<35x48xf32, #tpu.memory_space<vmem>>, vector<16x48xf32>,
    %c1_38 = arith.constant 1 : index
    %c0_39 = arith.constant 0 : index
    %c0_40 = arith.constant 0 : index
    %27 = vector.load %arg1[%c1_38, %c0_39, %c0_40] : memref<2x16x48xf32, #tpu.memory_space<vmem>>, vector<1x16x48xf32>
    %28 = vector.shape_cast %27 : vector<1x16x48xf32> to vector<16x48xf32>
    %c18_41 = arith.constant 18 : index
    %c0_42 = arith.constant 0 : index
    %29 = vector.load %arg15[%c18_41, %c0_42] : memref<35x48xf32, #tpu.memory_space<vmem>>, vector<16x48xf32>
    tpu.vector_store %arg15[%c18_41, %c0_42], %28 {strides = array<i32>} : memref<35x48xf32, #tpu.memory_space<vmem>>, vector<16x48xf32>,
    %c0_43 = arith.constant 0 : index
    %c0_44 = arith.constant 0 : index
    %30 = vector.load %arg15[%c0_43, %c0_44] : memref<35x48xf32, #tpu.memory_space<vmem>>, vector<33x48xf32>
    %c0_45 = arith.constant 0 : index
    %c0_46 = arith.constant 0 : index
    %c0_47 = arith.constant 0 : index
    %31 = vector.load %arg2[%c0_45, %c0_46, %c0_47] : memref<3x48x128xf32, #tpu.memory_space<vmem>>, vector<1x48x128xf32>
    %32 = vector.shape_cast %31 : vector<1x48x128xf32> to vector<48x128xf32>
    %cst_48 = arith.constant dense<0.000000e+00> : vector<33x128xf32>
    %33 = tpu.matmul %30, %32, %cst_48 {dimension_numbers = #tpu.dot_dimension_numbers<[1], [0], [0], [1], [0, 0, 1, 1], [], []>} : vector<33x48xf32>, vector<48x128xf32>, vector<33x128xf32> -> vector<33x128xf32>
    %c1_49 = arith.constant 1 : index
    %c0_50 = arith.constant 0 : index
    %34 = vector.load %arg15[%c1_49, %c0_50] : memref<35x48xf32, #tpu.memory_space<vmem>>, vector<33x48xf32>
    %c1_51 = arith.constant 1 : index
    %c0_52 = arith.constant 0 : index
    %c0_53 = arith.constant 0 : index
    %35 = vector.load %arg2[%c1_51, %c0_52, %c0_53] : memref<3x48x128xf32, #tpu.memory_space<vmem>>, vector<1x48x128xf32>
    %36 = vector.shape_cast %35 : vector<1x48x128xf32> to vector<48x128xf32>
    %cst_54 = arith.constant dense<0.000000e+00> : vector<33x128xf32>
    %37 = tpu.matmul %34, %36, %cst_54 {dimension_numbers = #tpu.dot_dimension_numbers<[1], [0], [0], [1], [0, 0, 1, 1], [], []>} : vector<33x48xf32>, vector<48x128xf32>, vector<33x128xf32> -> vector<33x128xf32>
    %38 = arith.addf %33, %37 : vector<33x128xf32>
    %c2 = arith.constant 2 : index
    %c0_55 = arith.constant 0 : index
    %39 = vector.load %arg15[%c2, %c0_55] : memref<35x48xf32, #tpu.memory_space<vmem>>, vector<33x48xf32>
    %c2_56 = arith.constant 2 : index
    %c0_57 = arith.constant 0 : index
    %c0_58 = arith.constant 0 : index
    %40 = vector.load %arg2[%c2_56, %c0_57, %c0_58] : memref<3x48x128xf32, #tpu.memory_space<vmem>>, vector<1x48x128xf32>
    %41 = vector.shape_cast %40 : vector<1x48x128xf32> to vector<48x128xf32>
    %cst_59 = arith.constant dense<0.000000e+00> : vector<33x128xf32>
    %42 = tpu.matmul %39, %41, %cst_59 {dimension_numbers = #tpu.dot_dimension_numbers<[1], [0], [0], [1], [0, 0, 1, 1], [], []>} : vector<33x48xf32>, vector<48x128xf32>, vector<33x128xf32> -> vector<33x128xf32>
    %43 = arith.addf %38, %42 : vector<33x128xf32>
    %c0_60 = arith.constant 0 : index
    %c0_61 = arith.constant 0 : index
    %44 = vector.load %arg3[%c0_60, %c0_61] : memref<1x128xf32, #tpu.memory_space<vmem>>, vector<1x128xf32>
    %45 = vector.broadcast %44 : vector<1x128xf32> to vector<33x128xf32>
    %46 = arith.addf %43, %45 : vector<33x128xf32>
    %cst_62 = arith.constant 0.000000e+00 : f32
    %47 = vector.broadcast %cst_62 : f32 to vector<33x128xf32>
    %48 = arith.maximumf %46, %47 : vector<33x128xf32>
    %49 = vector.extract_strided_slice %48 {offsets = [0, 0], sizes = [16, 128], strides = [1, 1]} : vector<33x128xf32> to vector<16x128xf32>
    %c1_63 = arith.constant 1 : index
    %c0_64 = arith.constant 0 : index
    %50 = vector.load %arg16[%c1_63, %c0_64] : memref<35x128xf32, #tpu.memory_space<vmem>>, vector<16x128xf32>
    tpu.vector_store %arg16[%c1_63, %c0_64], %49 {strides = array<i32>} : memref<35x128xf32, #tpu.memory_space<vmem>>, vector<16x128xf32>,
    %51 = vector.extract_strided_slice %48 {offsets = [17, 0], sizes = [16, 128], strides = [1, 1]} : vector<33x128xf32> to vector<16x128xf32>
    %c18_65 = arith.constant 18 : index
    %c0_66 = arith.constant 0 : index
    %52 = vector.load %arg16[%c18_65, %c0_66] : memref<35x128xf32, #tpu.memory_space<vmem>>, vector<16x128xf32>
    tpu.vector_store %arg16[%c18_65, %c0_66], %51 {strides = array<i32>} : memref<35x128xf32, #tpu.memory_space<vmem>>, vector<16x128xf32>,
    %c0_67 = arith.constant 0 : index
    %c0_68 = arith.constant 0 : index
    %53 = vector.load %arg16[%c0_67, %c0_68] : memref<35x128xf32, #tpu.memory_space<vmem>>, vector<33x128xf32>
    %c0_69 = arith.constant 0 : index
    %c0_70 = arith.constant 0 : index
    %c0_71 = arith.constant 0 : index
    %54 = vector.load %arg4[%c0_69, %c0_70, %c0_71] : memref<3x128x128xf32, #tpu.memory_space<vmem>>, vector<1x128x128xf32>
    %55 = vector.shape_cast %54 : vector<1x128x128xf32> to vector<128x128xf32>
    %cst_72 = arith.constant dense<0.000000e+00> : vector<33x128xf32>
    %56 = tpu.matmul %53, %55, %cst_72 {dimension_numbers = #tpu.dot_dimension_numbers<[1], [0], [0], [1], [0, 0, 1, 1], [], []>} : vector<33x128xf32>, vector<128x128xf32>, vector<33x128xf32> -> vector<33x128xf32>
    %c1_73 = arith.constant 1 : index
    %c0_74 = arith.constant 0 : index
    %57 = vector.load %arg16[%c1_73, %c0_74] : memref<35x128xf32, #tpu.memory_space<vmem>>, vector<33x128xf32>
    %c1_75 = arith.constant 1 : index
    %c0_76 = arith.constant 0 : index
    %c0_77 = arith.constant 0 : index
    %58 = vector.load %arg4[%c1_75, %c0_76, %c0_77] : memref<3x128x128xf32, #tpu.memory_space<vmem>>, vector<1x128x128xf32>
    %59 = vector.shape_cast %58 : vector<1x128x128xf32> to vector<128x128xf32>
    %cst_78 = arith.constant dense<0.000000e+00> : vector<33x128xf32>
    %60 = tpu.matmul %57, %59, %cst_78 {dimension_numbers = #tpu.dot_dimension_numbers<[1], [0], [0], [1], [0, 0, 1, 1], [], []>} : vector<33x128xf32>, vector<128x128xf32>, vector<33x128xf32> -> vector<33x128xf32>
    %61 = arith.addf %56, %60 : vector<33x128xf32>
    %c2_79 = arith.constant 2 : index
    %c0_80 = arith.constant 0 : index
    %62 = vector.load %arg16[%c2_79, %c0_80] : memref<35x128xf32, #tpu.memory_space<vmem>>, vector<33x128xf32>
    %c2_81 = arith.constant 2 : index
    %c0_82 = arith.constant 0 : index
    %c0_83 = arith.constant 0 : index
    %63 = vector.load %arg4[%c2_81, %c0_82, %c0_83] : memref<3x128x128xf32, #tpu.memory_space<vmem>>, vector<1x128x128xf32>
    %64 = vector.shape_cast %63 : vector<1x128x128xf32> to vector<128x128xf32>
    %cst_84 = arith.constant dense<0.000000e+00> : vector<33x128xf32>
    %65 = tpu.matmul %62, %64, %cst_84 {dimension_numbers = #tpu.dot_dimension_numbers<[1], [0], [0], [1], [0, 0, 1, 1], [], []>} : vector<33x128xf32>, vector<128x128xf32>, vector<33x128xf32> -> vector<33x128xf32>
    %66 = arith.addf %61, %65 : vector<33x128xf32>
    %c0_85 = arith.constant 0 : index
    %c0_86 = arith.constant 0 : index
    %67 = vector.load %arg5[%c0_85, %c0_86] : memref<1x128xf32, #tpu.memory_space<vmem>>, vector<1x128xf32>
    %68 = vector.broadcast %67 : vector<1x128xf32> to vector<33x128xf32>
    %69 = arith.addf %66, %68 : vector<33x128xf32>
    %cst_87 = arith.constant 0.000000e+00 : f32
    %70 = vector.broadcast %cst_87 : f32 to vector<33x128xf32>
    %71 = arith.maximumf %69, %70 : vector<33x128xf32>
    %72 = vector.extract_strided_slice %71 {offsets = [0, 0], sizes = [16, 128], strides = [1, 1]} : vector<33x128xf32> to vector<16x128xf32>
    %c0_88 = arith.constant 0 : index
    %c0_89 = arith.constant 0 : index
    %73 = vector.load %arg17[%c0_88, %c0_89] : memref<32x128xf32, #tpu.memory_space<vmem>>, vector<16x128xf32>
    tpu.vector_store %arg17[%c0_88, %c0_89], %72 {strides = array<i32>} : memref<32x128xf32, #tpu.memory_space<vmem>>, vector<16x128xf32>,
    %74 = vector.extract_strided_slice %71 {offsets = [17, 0], sizes = [16, 128], strides = [1, 1]} : vector<33x128xf32> to vector<16x128xf32>
    %c16 = arith.constant 16 : index
    %c0_90 = arith.constant 0 : index
    %75 = vector.load %arg17[%c16, %c0_90] : memref<32x128xf32, #tpu.memory_space<vmem>>, vector<16x128xf32>
    tpu.vector_store %arg17[%c16, %c0_90], %74 {strides = array<i32>} : memref<32x128xf32, #tpu.memory_space<vmem>>, vector<16x128xf32>,
    %c0_91 = arith.constant 0 : index
    %c0_92 = arith.constant 0 : index
    %76 = tpu.strided_load %arg17[%c0_91, %c0_92] {strides = array<i32: 2, 1>} : memref<32x128xf32, #tpu.memory_space<vmem>>, vector<8x128xf32>
    %c1_93 = arith.constant 1 : index
    %c0_94 = arith.constant 0 : index
    %77 = tpu.strided_load %arg17[%c1_93, %c0_94] {strides = array<i32: 2, 1>} : memref<32x128xf32, #tpu.memory_space<vmem>>, vector<8x128xf32>
    %78 = arith.maximumf %76, %77 : vector<8x128xf32>
    %c120_i32 = arith.constant 120 : i32
    %79 = tpu.dynamic_rotate %78 by %c120_i32 dim 1 : vector<8x128xf32>, i32 -> vector<8x128xf32>
    %80 = arith.maximumf %78, %79 : vector<8x128xf32>
    %c1_95 = arith.constant 1 : index
    %c0_96 = arith.constant 0 : index
    %81 = vector.load %arg18[%c1_95, %c0_96] : memref<19x128xf32, #tpu.memory_space<vmem>>, vector<8x128xf32>
    tpu.vector_store %arg18[%c1_95, %c0_96], %80 {strides = array<i32>} : memref<19x128xf32, #tpu.memory_space<vmem>>, vector<8x128xf32>,
    %c16_97 = arith.constant 16 : index
    %c0_98 = arith.constant 0 : index
    %82 = tpu.strided_load %arg17[%c16_97, %c0_98] {strides = array<i32: 2, 1>} : memref<32x128xf32, #tpu.memory_space<vmem>>, vector<8x128xf32>
    %c17_99 = arith.constant 17 : index
    %c0_100 = arith.constant 0 : index
    %83 = tpu.strided_load %arg17[%c17_99, %c0_100] {strides = array<i32: 2, 1>} : memref<32x128xf32, #tpu.memory_space<vmem>>, vector<8x128xf32>
    %84 = arith.maximumf %82, %83 : vector<8x128xf32>
    %c120_i32_101 = arith.constant 120 : i32
    %85 = tpu.dynamic_rotate %84 by %c120_i32_101 dim 1 : vector<8x128xf32>, i32 -> vector<8x128xf32>
    %86 = arith.maximumf %84, %85 : vector<8x128xf32>
    %c10_102 = arith.constant 10 : index
    %c0_103 = arith.constant 0 : index
    %87 = vector.load %arg18[%c10_102, %c0_103] : memref<19x128xf32, #tpu.memory_space<vmem>>, vector<8x128xf32>
    tpu.vector_store %arg18[%c10_102, %c0_103], %86 {strides = array<i32>} : memref<19x128xf32, #tpu.memory_space<vmem>>, vector<8x128xf32>,
    %c0_104 = arith.constant 0 : index
    %c0_105 = arith.constant 0 : index
    %88 = vector.load %arg18[%c0_104, %c0_105] : memref<19x128xf32, #tpu.memory_space<vmem>>, vector<17x128xf32>
    %c0_106 = arith.constant 0 : index
    %c0_107 = arith.constant 0 : index
    %c0_108 = arith.constant 0 : index
    %89 = vector.load %arg6[%c0_106, %c0_107, %c0_108] : memref<3x128x128xf32, #tpu.memory_space<vmem>>, vector<1x128x128xf32>
    %90 = vector.shape_cast %89 : vector<1x128x128xf32> to vector<128x128xf32>
    %cst_109 = arith.constant dense<0.000000e+00> : vector<17x128xf32>
    %91 = tpu.matmul %88, %90, %cst_109 {dimension_numbers = #tpu.dot_dimension_numbers<[1], [0], [0], [1], [0, 0, 1, 1], [], []>} : vector<17x128xf32>, vector<128x128xf32>, vector<17x128xf32> -> vector<17x128xf32>
    %c1_110 = arith.constant 1 : index
    %c0_111 = arith.constant 0 : index
    %92 = vector.load %arg18[%c1_110, %c0_111] : memref<19x128xf32, #tpu.memory_space<vmem>>, vector<17x128xf32>
    %c1_112 = arith.constant 1 : index
    %c0_113 = arith.constant 0 : index
    %c0_114 = arith.constant 0 : index
    %93 = vector.load %arg6[%c1_112, %c0_113, %c0_114] : memref<3x128x128xf32, #tpu.memory_space<vmem>>, vector<1x128x128xf32>
    %94 = vector.shape_cast %93 : vector<1x128x128xf32> to vector<128x128xf32>
    %cst_115 = arith.constant dense<0.000000e+00> : vector<17x128xf32>
    %95 = tpu.matmul %92, %94, %cst_115 {dimension_numbers = #tpu.dot_dimension_numbers<[1], [0], [0], [1], [0, 0, 1, 1], [], []>} : vector<17x128xf32>, vector<128x128xf32>, vector<17x128xf32> -> vector<17x128xf32>
    %96 = arith.addf %91, %95 : vector<17x128xf32>
    %c2_116 = arith.constant 2 : index
    %c0_117 = arith.constant 0 : index
    %97 = vector.load %arg18[%c2_116, %c0_117] : memref<19x128xf32, #tpu.memory_space<vmem>>, vector<17x128xf32>
    %c2_118 = arith.constant 2 : index
    %c0_119 = arith.constant 0 : index
    %c0_120 = arith.constant 0 : index
    %98 = vector.load %arg6[%c2_118, %c0_119, %c0_120] : memref<3x128x128xf32, #tpu.memory_space<vmem>>, vector<1x128x128xf32>
    %99 = vector.shape_cast %98 : vector<1x128x128xf32> to vector<128x128xf32>
    %cst_121 = arith.constant dense<0.000000e+00> : vector<17x128xf32>
    %100 = tpu.matmul %97, %99, %cst_121 {dimension_numbers = #tpu.dot_dimension_numbers<[1], [0], [0], [1], [0, 0, 1, 1], [], []>} : vector<17x128xf32>, vector<128x128xf32>, vector<17x128xf32> -> vector<17x128xf32>
    %101 = arith.addf %96, %100 : vector<17x128xf32>
    %c0_122 = arith.constant 0 : index
    %c0_123 = arith.constant 0 : index
    %102 = vector.load %arg7[%c0_122, %c0_123] : memref<1x128xf32, #tpu.memory_space<vmem>>, vector<1x128xf32>
    %103 = vector.broadcast %102 : vector<1x128xf32> to vector<17x128xf32>
    %104 = arith.addf %101, %103 : vector<17x128xf32>
    %cst_124 = arith.constant 0.000000e+00 : f32
    %105 = vector.broadcast %cst_124 : f32 to vector<17x128xf32>
    %106 = arith.maximumf %104, %105 : vector<17x128xf32>
    %107 = vector.extract_strided_slice %106 {offsets = [0, 0], sizes = [8, 128], strides = [1, 1]} : vector<17x128xf32> to vector<8x128xf32>
    %c1_125 = arith.constant 1 : index
    %c0_126 = arith.constant 0 : index
    %108 = vector.load %arg19[%c1_125, %c0_126] : memref<19x128xf32, #tpu.memory_space<vmem>>, vector<8x128xf32>
    tpu.vector_store %arg19[%c1_125, %c0_126], %107 {strides = array<i32>} : memref<19x128xf32, #tpu.memory_space<vmem>>, vector<8x128xf32>,
    %109 = vector.extract_strided_slice %106 {offsets = [9, 0], sizes = [8, 128], strides = [1, 1]} : vector<17x128xf32> to vector<8x128xf32>
    %c10_127 = arith.constant 10 : index
    %c0_128 = arith.constant 0 : index
    %110 = vector.load %arg19[%c10_127, %c0_128] : memref<19x128xf32, #tpu.memory_space<vmem>>, vector<8x128xf32>
    tpu.vector_store %arg19[%c10_127, %c0_128], %109 {strides = array<i32>} : memref<19x128xf32, #tpu.memory_space<vmem>>, vector<8x128xf32>,
    %c0_129 = arith.constant 0 : index
    %c0_130 = arith.constant 0 : index
    %111 = vector.load %arg19[%c0_129, %c0_130] : memref<19x128xf32, #tpu.memory_space<vmem>>, vector<17x128xf32>
    %c0_131 = arith.constant 0 : index
    %c0_132 = arith.constant 0 : index
    %c0_133 = arith.constant 0 : index
    %112 = vector.load %arg8[%c0_131, %c0_132, %c0_133] : memref<3x128x128xf32, #tpu.memory_space<vmem>>, vector<1x128x128xf32>
    %113 = vector.shape_cast %112 : vector<1x128x128xf32> to vector<128x128xf32>
    %cst_134 = arith.constant dense<0.000000e+00> : vector<17x128xf32>
    %114 = tpu.matmul %111, %113, %cst_134 {dimension_numbers = #tpu.dot_dimension_numbers<[1], [0], [0], [1], [0, 0, 1, 1], [], []>} : vector<17x128xf32>, vector<128x128xf32>, vector<17x128xf32> -> vector<17x128xf32>
    %c1_135 = arith.constant 1 : index
    %c0_136 = arith.constant 0 : index
    %115 = vector.load %arg19[%c1_135, %c0_136] : memref<19x128xf32, #tpu.memory_space<vmem>>, vector<17x128xf32>
    %c1_137 = arith.constant 1 : index
    %c0_138 = arith.constant 0 : index
    %c0_139 = arith.constant 0 : index
    %116 = vector.load %arg8[%c1_137, %c0_138, %c0_139] : memref<3x128x128xf32, #tpu.memory_space<vmem>>, vector<1x128x128xf32>
    %117 = vector.shape_cast %116 : vector<1x128x128xf32> to vector<128x128xf32>
    %cst_140 = arith.constant dense<0.000000e+00> : vector<17x128xf32>
    %118 = tpu.matmul %115, %117, %cst_140 {dimension_numbers = #tpu.dot_dimension_numbers<[1], [0], [0], [1], [0, 0, 1, 1], [], []>} : vector<17x128xf32>, vector<128x128xf32>, vector<17x128xf32> -> vector<17x128xf32>
    %119 = arith.addf %114, %118 : vector<17x128xf32>
    %c2_141 = arith.constant 2 : index
    %c0_142 = arith.constant 0 : index
    %120 = vector.load %arg19[%c2_141, %c0_142] : memref<19x128xf32, #tpu.memory_space<vmem>>, vector<17x128xf32>
    %c2_143 = arith.constant 2 : index
    %c0_144 = arith.constant 0 : index
    %c0_145 = arith.constant 0 : index
    %121 = vector.load %arg8[%c2_143, %c0_144, %c0_145] : memref<3x128x128xf32, #tpu.memory_space<vmem>>, vector<1x128x128xf32>
    %122 = vector.shape_cast %121 : vector<1x128x128xf32> to vector<128x128xf32>
    %cst_146 = arith.constant dense<0.000000e+00> : vector<17x128xf32>
    %123 = tpu.matmul %120, %122, %cst_146 {dimension_numbers = #tpu.dot_dimension_numbers<[1], [0], [0], [1], [0, 0, 1, 1], [], []>} : vector<17x128xf32>, vector<128x128xf32>, vector<17x128xf32> -> vector<17x128xf32>
    %124 = arith.addf %119, %123 : vector<17x128xf32>
    %c0_147 = arith.constant 0 : index
    %c0_148 = arith.constant 0 : index
    %125 = vector.load %arg9[%c0_147, %c0_148] : memref<1x128xf32, #tpu.memory_space<vmem>>, vector<1x128xf32>
    %126 = vector.broadcast %125 : vector<1x128xf32> to vector<17x128xf32>
    %127 = arith.addf %124, %126 : vector<17x128xf32>
    %cst_149 = arith.constant 0.000000e+00 : f32
    %128 = vector.broadcast %cst_149 : f32 to vector<17x128xf32>
    %129 = arith.maximumf %127, %128 : vector<17x128xf32>
    %130 = vector.extract_strided_slice %129 {offsets = [0, 0], sizes = [8, 128], strides = [1, 1]} : vector<17x128xf32> to vector<8x128xf32>
    %c0_150 = arith.constant 0 : index
    %c0_151 = arith.constant 0 : index
    %131 = vector.load %arg20[%c0_150, %c0_151] : memref<16x128xf32, #tpu.memory_space<vmem>>, vector<8x128xf32>
    tpu.vector_store %arg20[%c0_150, %c0_151], %130 {strides = array<i32>} : memref<16x128xf32, #tpu.memory_space<vmem>>, vector<8x128xf32>,
    %132 = vector.extract_strided_slice %129 {offsets = [9, 0], sizes = [8, 128], strides = [1, 1]} : vector<17x128xf32> to vector<8x128xf32>
    %c8 = arith.constant 8 : index
    %c0_152 = arith.constant 0 : index
    %133 = vector.load %arg20[%c8, %c0_152] : memref<16x128xf32, #tpu.memory_space<vmem>>, vector<8x128xf32>
    tpu.vector_store %arg20[%c8, %c0_152], %132 {strides = array<i32>} : memref<16x128xf32, #tpu.memory_space<vmem>>, vector<8x128xf32>,
    %c0_153 = arith.constant 0 : index
    %c0_154 = arith.constant 0 : index
    %134 = tpu.strided_load %arg20[%c0_153, %c0_154] {strides = array<i32: 2, 1>} : memref<16x128xf32, #tpu.memory_space<vmem>>, vector<4x128xf32>
    %c1_155 = arith.constant 1 : index
    %c0_156 = arith.constant 0 : index
    %135 = tpu.strided_load %arg20[%c1_155, %c0_156] {strides = array<i32: 2, 1>} : memref<16x128xf32, #tpu.memory_space<vmem>>, vector<4x128xf32>
    %136 = arith.maximumf %134, %135 : vector<4x128xf32>
    %c112_i32 = arith.constant 112 : i32
    %137 = tpu.dynamic_rotate %136 by %c112_i32 dim 1 : vector<4x128xf32>, i32 -> vector<4x128xf32>
    %138 = arith.maximumf %136, %137 : vector<4x128xf32>
    %c1_157 = arith.constant 1 : index
    %c0_158 = arith.constant 0 : index
    %139 = vector.load %arg21[%c1_157, %c0_158] : memref<11x128xf32, #tpu.memory_space<vmem>>, vector<4x128xf32>
    tpu.vector_store %arg21[%c1_157, %c0_158], %138 {strides = array<i32>} : memref<11x128xf32, #tpu.memory_space<vmem>>, vector<4x128xf32>,
    %c8_159 = arith.constant 8 : index
    %c0_160 = arith.constant 0 : index
    %140 = tpu.strided_load %arg20[%c8_159, %c0_160] {strides = array<i32: 2, 1>} : memref<16x128xf32, #tpu.memory_space<vmem>>, vector<4x128xf32>
    %c9_161 = arith.constant 9 : index
    %c0_162 = arith.constant 0 : index
    %141 = tpu.strided_load %arg20[%c9_161, %c0_162] {strides = array<i32: 2, 1>} : memref<16x128xf32, #tpu.memory_space<vmem>>, vector<4x128xf32>
    %142 = arith.maximumf %140, %141 : vector<4x128xf32>
    %c112_i32_163 = arith.constant 112 : i32
    %143 = tpu.dynamic_rotate %142 by %c112_i32_163 dim 1 : vector<4x128xf32>, i32 -> vector<4x128xf32>
    %144 = arith.maximumf %142, %143 : vector<4x128xf32>
    %c6 = arith.constant 6 : index
    %c0_164 = arith.constant 0 : index
    %145 = vector.load %arg21[%c6, %c0_164] : memref<11x128xf32, #tpu.memory_space<vmem>>, vector<4x128xf32>
    tpu.vector_store %arg21[%c6, %c0_164], %144 {strides = array<i32>} : memref<11x128xf32, #tpu.memory_space<vmem>>, vector<4x128xf32>,
    %c0_165 = arith.constant 0 : index
    %c0_166 = arith.constant 0 : index
    %146 = vector.load %arg21[%c0_165, %c0_166] : memref<11x128xf32, #tpu.memory_space<vmem>>, vector<9x128xf32>
    %c0_167 = arith.constant 0 : index
    %c0_168 = arith.constant 0 : index
    %c0_169 = arith.constant 0 : index
    %147 = vector.load %arg10[%c0_167, %c0_168, %c0_169] : memref<3x128x128xf32, #tpu.memory_space<vmem>>, vector<1x128x128xf32>
    %148 = vector.shape_cast %147 : vector<1x128x128xf32> to vector<128x128xf32>
    %cst_170 = arith.constant dense<0.000000e+00> : vector<9x128xf32>
    %149 = tpu.matmul %146, %148, %cst_170 {dimension_numbers = #tpu.dot_dimension_numbers<[1], [0], [0], [1], [0, 0, 1, 1], [], []>} : vector<9x128xf32>, vector<128x128xf32>, vector<9x128xf32> -> vector<9x128xf32>
    %c1_171 = arith.constant 1 : index
    %c0_172 = arith.constant 0 : index
    %150 = vector.load %arg21[%c1_171, %c0_172] : memref<11x128xf32, #tpu.memory_space<vmem>>, vector<9x128xf32>
    %c1_173 = arith.constant 1 : index
    %c0_174 = arith.constant 0 : index
    %c0_175 = arith.constant 0 : index
    %151 = vector.load %arg10[%c1_173, %c0_174, %c0_175] : memref<3x128x128xf32, #tpu.memory_space<vmem>>, vector<1x128x128xf32>
    %152 = vector.shape_cast %151 : vector<1x128x128xf32> to vector<128x128xf32>
    %cst_176 = arith.constant dense<0.000000e+00> : vector<9x128xf32>
    %153 = tpu.matmul %150, %152, %cst_176 {dimension_numbers = #tpu.dot_dimension_numbers<[1], [0], [0], [1], [0, 0, 1, 1], [], []>} : vector<9x128xf32>, vector<128x128xf32>, vector<9x128xf32> -> vector<9x128xf32>
    %154 = arith.addf %149, %153 : vector<9x128xf32>
    %c2_177 = arith.constant 2 : index
    %c0_178 = arith.constant 0 : index
    %155 = vector.load %arg21[%c2_177, %c0_178] : memref<11x128xf32, #tpu.memory_space<vmem>>, vector<9x128xf32>
    %c2_179 = arith.constant 2 : index
    %c0_180 = arith.constant 0 : index
    %c0_181 = arith.constant 0 : index
    %156 = vector.load %arg10[%c2_179, %c0_180, %c0_181] : memref<3x128x128xf32, #tpu.memory_space<vmem>>, vector<1x128x128xf32>
    %157 = vector.shape_cast %156 : vector<1x128x128xf32> to vector<128x128xf32>
    %cst_182 = arith.constant dense<0.000000e+00> : vector<9x128xf32>
    %158 = tpu.matmul %155, %157, %cst_182 {dimension_numbers = #tpu.dot_dimension_numbers<[1], [0], [0], [1], [0, 0, 1, 1], [], []>} : vector<9x128xf32>, vector<128x128xf32>, vector<9x128xf32> -> vector<9x128xf32>
    %159 = arith.addf %154, %158 : vector<9x128xf32>
    %c0_183 = arith.constant 0 : index
    %c0_184 = arith.constant 0 : index
    %160 = vector.load %arg11[%c0_183, %c0_184] : memref<1x128xf32, #tpu.memory_space<vmem>>, vector<1x128xf32>
    %161 = vector.broadcast %160 : vector<1x128xf32> to vector<9x128xf32>
    %162 = arith.addf %159, %161 : vector<9x128xf32>
    %cst_185 = arith.constant 0.000000e+00 : f32
    %163 = vector.broadcast %cst_185 : f32 to vector<9x128xf32>
    %164 = arith.maximumf %162, %163 : vector<9x128xf32>
    %165 = vector.extract_strided_slice %164 {offsets = [0, 0], sizes = [4, 128], strides = [1, 1]} : vector<9x128xf32> to vector<4x128xf32>
    %c1_186 = arith.constant 1 : index
    %c0_187 = arith.constant 0 : index
    %166 = vector.load %arg22[%c1_186, %c0_187] : memref<11x128xf32, #tpu.memory_space<vmem>>, vector<4x128xf32>
    tpu.vector_store %arg22[%c1_186, %c0_187], %165 {strides = array<i32>} : memref<11x128xf32, #tpu.memory_space<vmem>>, vector<4x128xf32>,
    %167 = vector.extract_strided_slice %164 {offsets = [5, 0], sizes = [4, 128], strides = [1, 1]} : vector<9x128xf32> to vector<4x128xf32>
    %c6_188 = arith.constant 6 : index
    %c0_189 = arith.constant 0 : index
    %168 = vector.load %arg22[%c6_188, %c0_189] : memref<11x128xf32, #tpu.memory_space<vmem>>, vector<4x128xf32>
    tpu.vector_store %arg22[%c6_188, %c0_189], %167 {strides = array<i32>} : memref<11x128xf32, #tpu.memory_space<vmem>>, vector<4x128xf32>,
    %c0_190 = arith.constant 0 : index
    %c0_191 = arith.constant 0 : index
    %169 = vector.load %arg22[%c0_190, %c0_191] : memref<11x128xf32, #tpu.memory_space<vmem>>, vector<9x128xf32>
    %c0_192 = arith.constant 0 : index
    %c0_193 = arith.constant 0 : index
    %c0_194 = arith.constant 0 : index
    %170 = vector.load %arg12[%c0_192, %c0_193, %c0_194] : memref<3x128x128xf32, #tpu.memory_space<vmem>>, vector<1x128x128xf32>
    %171 = vector.shape_cast %170 : vector<1x128x128xf32> to vector<128x128xf32>
    %cst_195 = arith.constant dense<0.000000e+00> : vector<9x128xf32>
    %172 = tpu.matmul %169, %171, %cst_195 {dimension_numbers = #tpu.dot_dimension_numbers<[1], [0], [0], [1], [0, 0, 1, 1], [], []>} : vector<9x128xf32>, vector<128x128xf32>, vector<9x128xf32> -> vector<9x128xf32>
    %c1_196 = arith.constant 1 : index
    %c0_197 = arith.constant 0 : index
    %173 = vector.load %arg22[%c1_196, %c0_197] : memref<11x128xf32, #tpu.memory_space<vmem>>, vector<9x128xf32>
    %c1_198 = arith.constant 1 : index
    %c0_199 = arith.constant 0 : index
    %c0_200 = arith.constant 0 : index
    %174 = vector.load %arg12[%c1_198, %c0_199, %c0_200] : memref<3x128x128xf32, #tpu.memory_space<vmem>>, vector<1x128x128xf32>
    %175 = vector.shape_cast %174 : vector<1x128x128xf32> to vector<128x128xf32>
    %cst_201 = arith.constant dense<0.000000e+00> : vector<9x128xf32>
    %176 = tpu.matmul %173, %175, %cst_201 {dimension_numbers = #tpu.dot_dimension_numbers<[1], [0], [0], [1], [0, 0, 1, 1], [], []>} : vector<9x128xf32>, vector<128x128xf32>, vector<9x128xf32> -> vector<9x128xf32>
    %177 = arith.addf %172, %176 : vector<9x128xf32>
    %c2_202 = arith.constant 2 : index
    %c0_203 = arith.constant 0 : index
    %178 = vector.load %arg22[%c2_202, %c0_203] : memref<11x128xf32, #tpu.memory_space<vmem>>, vector<9x128xf32>
    %c2_204 = arith.constant 2 : index
    %c0_205 = arith.constant 0 : index
    %c0_206 = arith.constant 0 : index
    %179 = vector.load %arg12[%c2_204, %c0_205, %c0_206] : memref<3x128x128xf32, #tpu.memory_space<vmem>>, vector<1x128x128xf32>
    %180 = vector.shape_cast %179 : vector<1x128x128xf32> to vector<128x128xf32>
    %cst_207 = arith.constant dense<0.000000e+00> : vector<9x128xf32>
    %181 = tpu.matmul %178, %180, %cst_207 {dimension_numbers = #tpu.dot_dimension_numbers<[1], [0], [0], [1], [0, 0, 1, 1], [], []>} : vector<9x128xf32>, vector<128x128xf32>, vector<9x128xf32> -> vector<9x128xf32>
    %182 = arith.addf %177, %181 : vector<9x128xf32>
    %c0_208 = arith.constant 0 : index
    %c0_209 = arith.constant 0 : index
    %183 = vector.load %arg13[%c0_208, %c0_209] : memref<1x128xf32, #tpu.memory_space<vmem>>, vector<1x128xf32>
    %184 = vector.broadcast %183 : vector<1x128xf32> to vector<9x128xf32>
    %185 = arith.addf %182, %184 : vector<9x128xf32>
    %cst_210 = arith.constant 0.000000e+00 : f32
    %186 = vector.broadcast %cst_210 : f32 to vector<9x128xf32>
    %187 = arith.maximumf %185, %186 : vector<9x128xf32>
    %188 = vector.extract_strided_slice %187 {offsets = [0, 0], sizes = [4, 128], strides = [1, 1]} : vector<9x128xf32> to vector<4x128xf32>
    %c0_211 = arith.constant 0 : index
    %c0_212 = arith.constant 0 : index
    %189 = vector.load %arg23[%c0_211, %c0_212] : memref<8x128xf32, #tpu.memory_space<vmem>>, vector<4x128xf32>
    tpu.vector_store %arg23[%c0_211, %c0_212], %188 {strides = array<i32>} : memref<8x128xf32, #tpu.memory_space<vmem>>, vector<4x128xf32>,
    %190 = vector.extract_strided_slice %187 {offsets = [5, 0], sizes = [4, 128], strides = [1, 1]} : vector<9x128xf32> to vector<4x128xf32>
    %c4 = arith.constant 4 : index
    %c0_213 = arith.constant 0 : index
    %191 = vector.load %arg23[%c4, %c0_213] : memref<8x128xf32, #tpu.memory_space<vmem>>, vector<4x128xf32>
    tpu.vector_store %arg23[%c4, %c0_213], %190 {strides = array<i32>} : memref<8x128xf32, #tpu.memory_space<vmem>>, vector<4x128xf32>,
    %c0_214 = arith.constant 0 : index
    %c0_215 = arith.constant 0 : index
    %192 = tpu.strided_load %arg23[%c0_214, %c0_215] {strides = array<i32: 2, 1>} : memref<8x128xf32, #tpu.memory_space<vmem>>, vector<2x128xf32>
    %c1_216 = arith.constant 1 : index
    %c0_217 = arith.constant 0 : index
    %193 = tpu.strided_load %arg23[%c1_216, %c0_217] {strides = array<i32: 2, 1>} : memref<8x128xf32, #tpu.memory_space<vmem>>, vector<2x128xf32>
    %194 = arith.maximumf %192, %193 : vector<2x128xf32>
    %c96_i32 = arith.constant 96 : i32
    %195 = tpu.dynamic_rotate %194 by %c96_i32 dim 1 : vector<2x128xf32>, i32 -> vector<2x128xf32>
    %196 = arith.maximumf %194, %195 : vector<2x128xf32>
    %c0_218 = arith.constant 0 : index
    %c0_219 = arith.constant 0 : index
    %c0_220 = arith.constant 0 : index
    %197 = vector.load %arg14[%c0_218, %c0_219, %c0_220] : memref<2x2x128xf32, #tpu.memory_space<vmem>>, vector<1x2x128xf32>
    %198 = vector.shape_cast %197 : vector<1x2x128xf32> to vector<2x128xf32>
    %199 = vector.shape_cast %196 : vector<2x128xf32> to vector<1x2x128xf32>
    tpu.vector_store %arg14[%c0_218, %c0_219, %c0_220], %199 {strides = array<i32>} : memref<2x2x128xf32, #tpu.memory_space<vmem>>, vector<1x2x128xf32>,
    %c4_221 = arith.constant 4 : index
    %c0_222 = arith.constant 0 : index
    %200 = tpu.strided_load %arg23[%c4_221, %c0_222] {strides = array<i32: 2, 1>} : memref<8x128xf32, #tpu.memory_space<vmem>>, vector<2x128xf32>
    %c5_223 = arith.constant 5 : index
    %c0_224 = arith.constant 0 : index
    %201 = tpu.strided_load %arg23[%c5_223, %c0_224] {strides = array<i32: 2, 1>} : memref<8x128xf32, #tpu.memory_space<vmem>>, vector<2x128xf32>
    %202 = arith.maximumf %200, %201 : vector<2x128xf32>
    %c96_i32_225 = arith.constant 96 : i32
    %203 = tpu.dynamic_rotate %202 by %c96_i32_225 dim 1 : vector<2x128xf32>, i32 -> vector<2x128xf32>
    %204 = arith.maximumf %202, %203 : vector<2x128xf32>
    %c1_226 = arith.constant 1 : index
    %c0_227 = arith.constant 0 : index
    %c0_228 = arith.constant 0 : index
    %205 = vector.load %arg14[%c1_226, %c0_227, %c0_228] : memref<2x2x128xf32, #tpu.memory_space<vmem>>, vector<1x2x128xf32>
    %206 = vector.shape_cast %205 : vector<1x2x128xf32> to vector<2x128xf32>
    %207 = vector.shape_cast %204 : vector<2x128xf32> to vector<1x2x128xf32>
    tpu.vector_store %arg14[%c1_226, %c0_227, %c0_228], %207 {strides = array<i32>} : memref<2x2x128xf32, #tpu.memory_space<vmem>>, vector<1x2x128xf32>,
    return
  }
  func.func @transform_0(%arg0: i32) -> (i32, i32, i32) {
    %c0_i32 = arith.constant 0 : i32
    %c0_i32_0 = arith.constant 0 : i32
    %c0_i32_1 = arith.constant 0 : i32
    return %arg0, %c0_i32, %c0_i32_0 : i32, i32, i32
  }
  func.func @transform_1(%arg0: i32) -> (i32, i32, i32) {
    %c0_i32 = arith.constant 0 : i32
    %c0_i32_0 = arith.constant 0 : i32
    %c0_i32_1 = arith.constant 0 : i32
    %c0_i32_2 = arith.constant 0 : i32
    return %c0_i32, %c0_i32_0, %c0_i32_1 : i32, i32, i32
  }
  func.func @transform_2(%arg0: i32) -> (i32, i32) {
    %c0_i32 = arith.constant 0 : i32
    %c0_i32_0 = arith.constant 0 : i32
    %c0_i32_1 = arith.constant 0 : i32
    return %c0_i32, %c0_i32_0 : i32, i32
  }
  func.func @transform_3(%arg0: i32) -> (i32, i32, i32) {
    %c0_i32 = arith.constant 0 : i32
    %c0_i32_0 = arith.constant 0 : i32
    %c0_i32_1 = arith.constant 0 : i32
    %c0_i32_2 = arith.constant 0 : i32
    return %c0_i32, %c0_i32_0, %c0_i32_1 : i32, i32, i32
  }
  func.func @transform_4(%arg0: i32) -> (i32, i32) {
    %c0_i32 = arith.constant 0 : i32
    %c0_i32_0 = arith.constant 0 : i32
    %c0_i32_1 = arith.constant 0 : i32
    return %c0_i32, %c0_i32_0 : i32, i32
  }
  func.func @transform_5(%arg0: i32) -> (i32, i32, i32) {
    %c0_i32 = arith.constant 0 : i32
    %c0_i32_0 = arith.constant 0 : i32
    %c0_i32_1 = arith.constant 0 : i32
    %c0_i32_2 = arith.constant 0 : i32
    return %c0_i32, %c0_i32_0, %c0_i32_1 : i32, i32, i32
  }
  func.func @transform_6(%arg0: i32) -> (i32, i32) {
    %c0_i32 = arith.constant 0 : i32
    %c0_i32_0 = arith.constant 0 : i32
    %c0_i32_1 = arith.constant 0 : i32
    return %c0_i32, %c0_i32_0 : i32, i32
  }
  func.func @transform_7(%arg0: i32) -> (i32, i32, i32) {
    %c0_i32 = arith.constant 0 : i32
    %c0_i32_0 = arith.constant 0 : i32
    %c0_i32_1 = arith.constant 0 : i32
    %c0_i32_2 = arith.constant 0 : i32
    return %c0_i32, %c0_i32_0, %c0_i32_1 : i32, i32, i32
  }
  func.func @transform_8(%arg0: i32) -> (i32, i32) {
    %c0_i32 = arith.constant 0 : i32
    %c0_i32_0 = arith.constant 0 : i32
    %c0_i32_1 = arith.constant 0 : i32
    return %c0_i32, %c0_i32_0 : i32, i32
  }
  func.func @transform_9(%arg0: i32) -> (i32, i32, i32) {
    %c0_i32 = arith.constant 0 : i32
    %c0_i32_0 = arith.constant 0 : i32
    %c0_i32_1 = arith.constant 0 : i32
    %c0_i32_2 = arith.constant 0 : i32
    return %c0_i32, %c0_i32_0, %c0_i32_1 : i32, i32, i32
  }
  func.func @transform_10(%arg0: i32) -> (i32, i32) {
    %c0_i32 = arith.constant 0 : i32
    %c0_i32_0 = arith.constant 0 : i32
    %c0_i32_1 = arith.constant 0 : i32
    return %c0_i32, %c0_i32_0 : i32, i32
  }
  func.func @transform_11(%arg0: i32) -> (i32, i32, i32) {
    %c0_i32 = arith.constant 0 : i32
    %c0_i32_0 = arith.constant 0 : i32
    %c0_i32_1 = arith.constant 0 : i32
    %c0_i32_2 = arith.constant 0 : i32
    return %c0_i32, %c0_i32_0, %c0_i32_1 : i32, i32, i32
  }
  func.func @transform_12(%arg0: i32) -> (i32, i32) {
    %c0_i32 = arith.constant 0 : i32
    %c0_i32_0 = arith.constant 0 : i32
    %c0_i32_1 = arith.constant 0 : i32
    return %c0_i32, %c0_i32_0 : i32, i32
  }
  func.func @transform_13(%arg0: i32) -> (i32, i32, i32) {
    %c0_i32 = arith.constant 0 : i32
    %c0_i32_0 = arith.constant 0 : i32
    %c0_i32_1 = arith.constant 0 : i32
    return %arg0, %c0_i32, %c0_i32_0 : i32, i32, i32
  }
}

</mosaic_0001>

<bundles_post_ra>
// kernel: tile.33
= control target key start
LH: loop header
LB: loop body
LE: loop exit
PB: predicated region body
PF: predicated region fallthrough
CT: control target
= control target key end

     0   :  { %s28_s0 = inlined_call_operand.vmem [shape: f32[8], index: 0, kind: input, shape index: {}]   ;;  %s29_s1 = inlined_call_operand.vmem [shape: f32[16,8], index: 1, kind: output, shape index: {}]  }
   0x1   :  { %v4_v0 = vld [vmem:[%s28_s0] ss:$0 sm:$0xff] }
   0x2   :  { %5 = vst [vmem:[%s29_s1] sm:$0xff] %v4_v0  ;;  %8 = vst [vmem:[%s29_s1 + $0x8] sm:$0xff] %v4_v0 }

// kernel: tile.34
= control target key start
LH: loop header
LB: loop body
LE: loop exit
PB: predicated region body
PF: predicated region fallthrough
CT: control target
= control target key end

     0   :  { %s131_s10 = smov 120   ;;  %s132_s11 = smov 104   ;;  %vm3_vm0 = vcmask 64512   ;;  %vm9_vm1 = vcmask 1048512   ;;  %vm15_vm2 = vcmask 982912   ;;  %vm21_vm3 = vcmask 917312   ;;  %s207_s0 = inlined_call_operand.vmem [shape: f32[16,8], index: 0, kind: input, shape index: {}]   ;;  %s208_s1 = inlined_call_operand.vmem [shape: f32[1,128], index: 1, kind: output, shape index: {}]  }
   0x1   :  { %v101_v0 = vld [vmem:[%s207_s0 + $0xf] sm:$0x1]   ;;  %v103_v1 = vld [vmem:[%s207_s0 + $0xd] sm:$0x1]   ;;  %v102_v2 = vld [vmem:[%s207_s0 + $0xe] sm:$0x1]  }
   0x2   :  { %7 = vrot.lane.b32.xlu0 %v101_v0, %s131_s10  ;;  %19 = vrot.lane.b32.xlu1 %v103_v1, %s132_s11  ;;  %v104_v3 = vld [vmem:[%s207_s0 + $0xc] sm:$0x1]   ;;  %s133_s16 = smov 112   ;;  %s134_s17 = smov 96   ;;  %v105_v4 = vld [vmem:[%s207_s0 + $0xb] sm:$0x1]  }
   0x3   :  { %v106_v5 = vld [vmem:[%s207_s0 + $0xa] sm:$0x1]   ;;  %v2_v6 = vld [vmem:[%s207_s0] sm:$0x1]   ;;  %s135_s24 = smov 88   ;;  %s136_s25 = smov 80  }
   0x4   :  { %4 = vst.msk [vmem:[#allocation0] sm:$0x1] %vm3_vm0, %v2_v6   ;;  %v107_v7 = vld [vmem:[%s207_s0 + $0x9] sm:$0x1]   ;;  %v108_v8 = vld [vmem:[%s207_s0 + $0x8] sm:$0x1]  }
   0x5   :  { %s137_s30 = smov 72   ;;  %s138_s2 = smov 64   ;;  %v109_v9 = vld [vmem:[%s207_s0 + $0x7] sm:$0x1]   ;;  %v110_v10 = vld [vmem:[%s207_s0 + $0x6] sm:$0x1]  }
   0x6   :  { %13 = vrot.lane.b32.xlu0 %v102_v2, %s133_s16  ;;  %25 = vrot.lane.b32.xlu1 %v104_v3, %s134_s17  ;;  %s139_s7 = smov 56   ;;  %s140_s8 = smov 48   ;;  %v111_v11 = vld [vmem:[%s207_s0 + $0x5] sm:$0x1]   ;;  %v112_v12 = vld [vmem:[%s207_s0 + $0x4] sm:$0x1]  }
   0x7   :  { %s141_s13 = smov 40   ;;  %s142_s14 = smov 32   ;;  %v113_v13 = vld [vmem:[%s207_s0 + $0x3] sm:$0x1]   ;;  %v114_v14 = vld [vmem:[%s207_s0 + $0x2] sm:$0x1]  }
   0x8   :  { %s143_s19 = smov 24   ;;  %s144_s20 = smov 16   ;;  %v115_v15 = vld [vmem:[%s207_s0 + $0x1] sm:$0x1]   ;;  %vm27_vm4 = vcmask 851712   ;;  %vm33_vm5 = vcmask 786112  }
   0x9   :  { %s145_s0 = smov 8   ;;  %vm39_vm6 = vcmask 720512   ;;  %vm45_vm7 = vcmask 654912   ;;  %vm51_vm8 = vcmask 589312   ;;  %vm57_vm9 = vcmask 523712  }
   0xa   :  { %31 = vrot.lane.b32.xlu0 %v105_v4, %s135_s24  ;;  %37 = vrot.lane.b32.xlu1 %v106_v5, %s136_s25  ;;  %vm63_vm10 = vcmask 458112   ;;  %vm69_vm11 = vcmask 392512   ;;  %vm75_vm12 = vcmask 326912   ;;  %vm81_vm13 = vcmask 261312  }
   0xb   :  { %vm87_vm14 = vcmask 195712   ;;  %vm93_vm15 = vcmask 130112  }
   0xe   :  { %43 = vrot.lane.b32.xlu0 %v107_v7, %s137_s30  ;;  %49 = vrot.lane.b32.xlu1 %v108_v8, %s138_s2 }
  0x12   :  { %55 = vrot.lane.b32.xlu0 %v109_v9, %s139_s7  ;;  %61 = vrot.lane.b32.xlu1 %v110_v10, %s140_s8 }
  0x16   :  { %67 = vrot.lane.b32.xlu0 %v111_v11, %s141_s13  ;;  %73 = vrot.lane.b32.xlu1 %v112_v12, %s142_s14 }
  0x1a   :  { %79 = vrot.lane.b32.xlu0 %v113_v13, %s143_s19  ;;  %85 = vrot.lane.b32.xlu1 %v114_v14, %s144_s20 }
  0x1e   :  { %91 = vrot.lane.b32.xlu0 %v115_v15, %s145_s0 }
  0x74   :  { %v8_v16 = vpop.permute.xlu0 %7   ;;  %v20_v17 = vpop.permute.xlu1 %19  }
  0x75   :  { %10 = vst.msk [vmem:[#allocation0] sm:$0x1] %vm9_vm1, %v8_v16  }
  0x78   :  { %v14_v18 = vpop.permute.xlu0 %13   ;;  %v26_v19 = vpop.permute.xlu1 %25  }
  0x79   :  { %16 = vst.msk [vmem:[#allocation0] sm:$0x1] %vm15_vm2, %v14_v18  }
  0x7a   :  { %22 = vst.msk [vmem:[#allocation0] sm:$0x1] %vm21_vm3, %v20_v17  }
  0x7b   :  { %28 = vst.msk [vmem:[#allocation0] sm:$0x1] %vm27_vm4, %v26_v19  }
  0x7c   :  { %v32_v20 = vpop.permute.xlu0 %31   ;;  %v38_v21 = vpop.permute.xlu1 %37  }
  0x7d   :  { %34 = vst.msk [vmem:[#allocation0] sm:$0x1] %vm33_vm5, %v32_v20  }
  0x7e   :  { %40 = vst.msk [vmem:[#allocation0] sm:$0x1] %vm39_vm6, %v38_v21  }
  0x80   :  { %v44_v22 = vpop.permute.xlu0 %43   ;;  %v50_v23 = vpop.permute.xlu1 %49  }
  0x81   :  { %46 = vst.msk [vmem:[#allocation0] sm:$0x1] %vm45_vm7, %v44_v22  }
  0x82   :  { %52 = vst.msk [vmem:[#allocation0] sm:$0x1] %vm51_vm8, %v50_v23  }
  0x84   :  { %v56_v24 = vpop.permute.xlu0 %55   ;;  %v62_v25 = vpop.permute.xlu1 %61  }
  0x85   :  { %58 = vst.msk [vmem:[#allocation0] sm:$0x1] %vm57_vm9, %v56_v24  }
  0x86   :  { %64 = vst.msk [vmem:[#allocation0] sm:$0x1] %vm63_vm10, %v62_v25  }
  0x88   :  { %v68_v26 = vpop.permute.xlu0 %67   ;;  %v74_v27 = vpop.permute.xlu1 %73  }
  0x89   :  { %70 = vst.msk [vmem:[#allocation0] sm:$0x1] %vm69_vm11, %v68_v26  }
  0x8a   :  { %76 = vst.msk [vmem:[#allocation0] sm:$0x1] %vm75_vm12, %v74_v27  }
  0x8c   :  { %v80_v28 = vpop.permute.xlu0 %79   ;;  %v86_v29 = vpop.permute.xlu1 %85  }
  0x8d   :  { %82 = vst.msk [vmem:[#allocation0] sm:$0x1] %vm81_vm13, %v80_v28  }
  0x8e   :  { %88 = vst.msk [vmem:[#allocation0] sm:$0x1] %vm87_vm14, %v86_v29  }
  0x90   :  { %v92_v30 = vpop.permute.xlu0 %91  }
  0x91   :  { %94 = vst.msk [vmem:[#allocation0] sm:$0x1] %vm93_vm15, %v92_v30  }
  0x98   :  { %v98_v31 = vld [vmem:[#allocation0] sm:$0x1] }
  0x99   :  { %100 = vst [vmem:[%s208_s1] sm:$0x1] %v98_v31 }

// kernel: tile.43
= control target key start
LH: loop header
LB: loop body
LE: loop exit
PB: predicated region body
PF: predicated region fallthrough
CT: control target
= control target key end

     0   :  { %s22_s0 = inlined_call_operand.vmem [shape: f32[16], index: 0, kind: input, shape index: {}]   ;;  %s23_s1 = inlined_call_operand.vmem [shape: f32[8,16], index: 1, kind: output, shape index: {}]  }
   0x1   :  { %v4_v0 = vld [vmem:[%s22_s0] ss:$0 sm:$0xff] }
   0x2   :  { %5 = vst [vmem:[%s23_s1] sm:$0xff] %v4_v0 }

// kernel: tile.44
= control target key start
LH: loop header
LB: loop body
LE: loop exit
PB: predicated region body
PF: predicated region fallthrough
CT: control target
= control target key end

     0   :  { %s67_s10 = smov 112   ;;  %s68_s11 = smov 80   ;;  %vm3_vm0 = vcmask 130048   ;;  %vm9_vm1 = vcmask 1048448   ;;  %vm15_vm2 = vcmask 917248   ;;  %vm21_vm3 = vcmask 786048   ;;  %s111_s0 = inlined_call_operand.vmem [shape: f32[8,16], index: 0, kind: input, shape index: {}]   ;;  %s112_s1 = inlined_call_operand.vmem [shape: f32[1,128], index: 1, kind: output, shape index: {}]  }
   0x1   :  { %v53_v0 = vld [vmem:[%s111_s0 + $0x7] sm:$0x1]   ;;  %v55_v1 = vld [vmem:[%s111_s0 + $0x5] sm:$0x1]   ;;  %v54_v2 = vld [vmem:[%s111_s0 + $0x6] sm:$0x1]  }
   0x2   :  { %7 = vrot.lane.b32.xlu0 %v53_v0, %s67_s10  ;;  %19 = vrot.lane.b32.xlu1 %v55_v1, %s68_s11  ;;  %v56_v3 = vld [vmem:[%s111_s0 + $0x4] sm:$0x1]   ;;  %v2_v4 = vld [vmem:[%s111_s0] sm:$0x1]   ;;  %s69_s18 = smov 96   ;;  %s70_s19 = smov 64  }
   0x3   :  { %4 = vst.msk [vmem:[#allocation0] sm:$0x1] %vm3_vm0, %v2_v4   ;;  %v57_v5 = vld [vmem:[%s111_s0 + $0x3] sm:$0x1]   ;;  %v58_v6 = vld [vmem:[%s111_s0 + $0x2] sm:$0x1]  }
   0x4   :  { %s71_s24 = smov 48   ;;  %s72_s25 = smov 32   ;;  %v59_v7 = vld [vmem:[%s111_s0 + $0x1] sm:$0x1]   ;;  %vm27_vm4 = vcmask 654848   ;;  %vm33_vm5 = vcmask 523648  }
   0x5   :  { %s73_s0 = smov 16   ;;  %vm39_vm6 = vcmask 392448   ;;  %vm45_vm7 = vcmask 261248  }
   0x6   :  { %13 = vrot.lane.b32.xlu0 %v54_v2, %s69_s18  ;;  %25 = vrot.lane.b32.xlu1 %v56_v3, %s70_s19 }
   0xa   :  { %31 = vrot.lane.b32.xlu0 %v57_v5, %s71_s24  ;;  %37 = vrot.lane.b32.xlu1 %v58_v6, %s72_s25 }
   0xe   :  { %43 = vrot.lane.b32.xlu0 %v59_v7, %s73_s0 }
  0x74   :  { %v8_v8 = vpop.permute.xlu0 %7   ;;  %v20_v9 = vpop.permute.xlu1 %19  }
  0x75   :  { %10 = vst.msk [vmem:[#allocation0] sm:$0x1] %vm9_vm1, %v8_v8  }
  0x78   :  { %v14_v10 = vpop.permute.xlu0 %13   ;;  %v26_v11 = vpop.permute.xlu1 %25  }
  0x79   :  { %16 = vst.msk [vmem:[#allocation0] sm:$0x1] %vm15_vm2, %v14_v10  }
  0x7a   :  { %22 = vst.msk [vmem:[#allocation0] sm:$0x1] %vm21_vm3, %v20_v9  }
  0x7b   :  { %28 = vst.msk [vmem:[#allocation0] sm:$0x1] %vm27_vm4, %v26_v11  }
  0x7c   :  { %v32_v12 = vpop.permute.xlu0 %31   ;;  %v38_v13 = vpop.permute.xlu1 %37  }
  0x7d   :  { %34 = vst.msk [vmem:[#allocation0] sm:$0x1] %vm33_vm5, %v32_v12  }
  0x7e   :  { %40 = vst.msk [vmem:[#allocation0] sm:$0x1] %vm39_vm6, %v38_v13  }
  0x80   :  { %v44_v14 = vpop.permute.xlu0 %43  }
  0x81   :  { %46 = vst.msk [vmem:[#allocation0] sm:$0x1] %vm45_vm7, %v44_v14  }
  0x88   :  { %v50_v15 = vld [vmem:[#allocation0] sm:$0x1] }
  0x89   :  { %52 = vst [vmem:[%s112_s1] sm:$0x1] %v50_v15 }

// kernel: tile.53
= control target key start
LH: loop header
LB: loop body
LE: loop exit
PB: predicated region body
PF: predicated region fallthrough
CT: control target
= control target key end

     0   :  { %s22_s0 = inlined_call_operand.vmem [shape: f32[32], index: 0, kind: input, shape index: {}]   ;;  %s23_s1 = inlined_call_operand.vmem [shape: f32[4,32], index: 1, kind: output, shape index: {}]  }
   0x1   :  { %v4_v0 = vld [vmem:[%s22_s0] ss:$0 sm:$0xff] }
   0x2   :  { %5 = vst [vmem:[%s23_s1] sm:$0xf] %v4_v0 }

// kernel: tile.54
= control target key start
LH: loop header
LB: loop body
LE: loop exit
PB: predicated region body
PF: predicated region fallthrough
CT: control target
= control target key end

     0   :  { %vm7_vm0 = vcmask 261120   ;;  %s37_s8 = smov 32   ;;  %s38_s9 = smov 64   ;;  %vm13_vm1 = vcmask 1048320   ;;  %vm19_vm2 = vcmask 785920   ;;  %vm25_vm3 = vcmask 523520   ;;  %s55_s0 = inlined_call_operand.vmem [shape: f32[4,32], index: 0, kind: input, shape index: {}]   ;;  %s56_s1 = inlined_call_operand.vmem [shape: f32[1,128], index: 1, kind: output, shape index: {}]  }
   0x1   :  { %v4_v0 = vld [vmem:[%s55_s0] sm:$0xf]  ;;  %s36_s0 = smov 96  }
   0x2   :  { %5 = vst [vmem:[#allocation1] sm:$0xf] %v4_v0 }
   0x9   :  { %v10_v1 = vld [vmem:[#allocation1 + $0x3] sm:$0x1]   ;;  %v22_v2 = vld [vmem:[#allocation1 + $0x1] sm:$0x1]   ;;  %v6_v3 = vld [vmem:[#allocation1] sm:$0x1]  }
   0xa   :  { %11 = vrot.lane.b32.xlu0 %v10_v1, %s36_s0  ;;  %23 = vrot.lane.b32.xlu1 %v22_v2, %s37_s8  ;;  %v16_v4 = vld [vmem:[#allocation1 + $0x2] sm:$0x1]   ;;  %8 = vst.msk [vmem:[#allocation0] sm:$0x1] %vm7_vm0, %v6_v3  }
   0xe   :  { %17 = vrot.lane.b32.xlu0 %v16_v4, %s38_s9 }
  0x7c   :  { %v12_v5 = vpop.permute.xlu0 %11   ;;  %v24_v6 = vpop.permute.xlu1 %23  }
  0x7d   :  { %14 = vst.msk [vmem:[#allocation0] sm:$0x1] %vm13_vm1, %v12_v5  }
  0x80   :  { %v18_v7 = vpop.permute.xlu0 %17  }
  0x81   :  { %20 = vst.msk [vmem:[#allocation0] sm:$0x1] %vm19_vm2, %v18_v7  }
  0x82   :  { %26 = vst.msk [vmem:[#allocation0] sm:$0x1] %vm25_vm3, %v24_v6  }
  0x89   :  { %v30_v8 = vld [vmem:[#allocation0] sm:$0x1] }
  0x8a   :  { %32 = vst [vmem:[%s56_s1] sm:$0x1] %v30_v8 }

// kernel: encoder_forward.1
= control target key start
LH: loop header
LB: loop body
LE: loop exit
PB: predicated region body
PF: predicated region fallthrough
CT: control target
= control target key end

     0   :  { %v3739_v0 = vmov 0.0|0.0   ;;  %v3740_v4 = vmov 0.0   ;;  %vm44_vm0 = vcmask 385024   ;;  %vm3741_vm1 = vmmov 0   ;;  %s3742_s18 = smov 120   ;;  %s3743_s17 = smov 112   ;;  %s4839_s1 = inlined_call_operand.vmem [shape: f32[3,48,128], index: 1, kind: input, shape index: {}]   ;;  %s4840_s0 = inlined_call_operand.vmem [shape: f32[2,16,48], index: 0, kind: input, shape index: {}]   ;;  %s4841_s3 = inlined_call_operand.vmem [shape: f32[3,128,128], index: 3, kind: input, shape index: {}]   ;;  %s4842_s2 = inlined_call_operand.vmem [shape: f32[1,128], index: 2, kind: input, shape index: {}]   ;;  %s4843_s5 = inlined_call_operand.vmem [shape: f32[3,128,128], index: 5, kind: input, shape index: {}]   ;;  %s4844_s4 = inlined_call_operand.vmem [shape: f32[1,128], index: 4, kind: input, shape index: {}]   ;;  %s4845_s7 = inlined_call_operand.vmem [shape: f32[3,128,128], index: 7, kind: input, shape index: {}]   ;;  %s4846_s6 = inlined_call_operand.vmem [shape: f32[1,128], index: 6, kind: input, shape index: {}]   ;;  %s4847_s9 = inlined_call_operand.vmem [shape: f32[3,128,128], index: 9, kind: input, shape index: {}]   ;;  %s4848_s8 = inlined_call_operand.vmem [shape: f32[1,128], index: 8, kind: input, shape index: {}]   ;;  %s4849_s11 = inlined_call_operand.vmem [shape: f32[3,128,128], index: 11, kind: input, shape index: {}]   ;;  %s4850_s10 = inlined_call_operand.vmem [shape: f32[1,128], index: 10, kind: input, shape index: {}]   ;;  %s4851_s12 = inlined_call_operand.vmem [shape: f32[1,128], index: 12, kind: input, shape index: {}]   ;;  %s4852_s13 = inlined_call_operand.vmem [shape: f32[2,2,128], index: 13, kind: output, shape index: {}]  }
   0x1   :  { %3290 = vmatprep.subr.bf16.mxu0 %v3739_v0  ;;  %v2100_v1 = vld [vmem:[%s4839_s1 + $0x30] sm:$0xff]  ;;  %v2101_v2 = vld [vmem:[%s4839_s1 + $0x38] sm:$0xff]  ;;  %3299 = vmatprep.subr.bf16.mxu1 %v3739_v0  ;;  %v78_v3 = vld [vmem:[%s4839_s1] sm:$0xff]  ;;  %48 = vst [vmem:[#allocation3] sm:$0x1] %v3740_v4  ;;  %vm65_vm2 = vcmask 392192  }
   0x2   :  { %49 = vst [vmem:[#allocation3 + $0x11] sm:$0x1] %v3740_v4  ;;  %50 = vst [vmem:[#allocation3 + $0x22] sm:$0x1] %v3740_v4  ;;  %v3291_v5 = vpack.c.bf16 %v2101_v2, %v2100_v1  ;;  %v79_v6 = vld [vmem:[%s4839_s1 + $0x8] sm:$0xff]  ;;  %v2102_v7 = vld [vmem:[%s4839_s1 + $0x40] sm:$0xff]  ;;  %2624 = vmatprep.mubr.msk.f32.mxu0 %vm3741_vm1, %v3740_v4  ;;  %2651 = vmatprep.mubr.msk.f32.mxu1 %vm3741_vm1, %v3740_v4 }
   0x3   :  { %51 = vst [vmem:[#allocation5] sm:$0x1] %v3740_v4  ;;  %52 = vst [vmem:[#allocation5 + $0x9] sm:$0x1] %v3740_v4  ;;  %v2103_v8 = vld [vmem:[%s4839_s1 + $0x48] sm:$0xff]  ;;  %v3300_v9 = vpack.c.bf16 %v79_v6, %v78_v3  ;;  %v80_v10 = vld [vmem:[%s4839_s1 + $0x10] sm:$0xff] }
   0x4   :  { %53 = vst [vmem:[#allocation5 + $0x12] sm:$0x1] %v3740_v4  ;;  %54 = vst [vmem:[#allocation6] sm:$0x1] %v3740_v4  ;;  %v81_v11 = vld [vmem:[%s4839_s1 + $0x18] sm:$0xff]  ;;  %3292 = vmatpush3.bf16.msra.mxu0 %v3291_v5  ;;  %v3294_v12 = vpack.c.bf16 %v2103_v8, %v2102_v7  ;;  %v2104_v13 = vld [vmem:[%s4839_s1 + $0x50] sm:$0xff] }
   0x5   :  { %55 = vst [vmem:[#allocation6 + $0x9] sm:$0x1] %v3740_v4  ;;  %56 = vst [vmem:[#allocation6 + $0x12] sm:$0x1] %v3740_v4  ;;  %3301 = vmatpush3.bf16.msra.mxu1 %v3300_v9  ;;  %3293 = vmatprep.subr.bf16.mxu0 %v3739_v0  ;;  %v3303_v14 = vpack.c.bf16 %v81_v11, %v80_v10  ;;  %v2105_v15 = vld [vmem:[%s4839_s1 + $0x58] sm:$0xff]  ;;  %v82_v16 = vld [vmem:[%s4839_s1 + $0x20] sm:$0xff] }
   0x6   :  { %57 = vst [vmem:[#allocation8] sm:$0x1] %v3740_v4  ;;  %58 = vst [vmem:[#allocation8 + $0x5] sm:$0x1] %v3740_v4  ;;  %v63_v17 = vld [vmem:[%s4840_s0] sm:$0xff]  ;;  %3302 = vmatprep.subr.bf16.mxu1 %v3739_v0  ;;  %v83_v18 = vld [vmem:[%s4839_s1 + $0x28] sm:$0xff]  ;;  %v3297_v22 = vpack.c.bf16 %v2105_v15, %v2104_v13 }
   0x7   :  { %59 = vst [vmem:[#allocation8 + $0xa] sm:$0x1] %v3740_v4  ;;  %60 = vst [vmem:[#allocation9] sm:$0x1] %v3740_v4  ;;  %v64_v19 = vld [vmem:[%s4840_s0 + $0x8] sm:$0xff]  ;;  %v2098_v20 = vld [vmem:[%s4840_s0 + $0x10] sm:$0xff]  ;;  %v3306_v23 = vpack.c.bf16 %v83_v18, %v82_v16 }
   0x8   :  { %61 = vst [vmem:[#allocation9 + $0x5] sm:$0x1] %v3740_v4  ;;  %62 = vst [vmem:[#allocation9 + $0xa] sm:$0x1] %v3740_v4  ;;  %v2099_v21 = vld [vmem:[%s4840_s0 + $0x18] sm:$0xff]  ;;  %3295 = vmatpush3.bf16.msra.mxu0 %v3294_v12  ;;  %v2116_v24 = vld [vmem:[%s4839_s1 + $0x60] sm:$0xff] }
   0x9   :  { %45 = vst.msk [vmem:[#allocation2] sm:$0x1] %vm44_vm0, %v3740_v4  ;;  %46 = vst.msk [vmem:[#allocation2 + $0x11] sm:$0x1] %vm44_vm0, %v3740_v4  ;;  %3304 = vmatpush3.bf16.msra.mxu1 %v3303_v14  ;;  %3296 = vmatprep.subr.bf16.mxu0 %v3739_v0  ;;  %v2117_v25 = vld [vmem:[%s4839_s1 + $0x68] sm:$0xff]  ;;  %v2118_v29 = vld [vmem:[%s4839_s1 + $0x70] sm:$0xff] }
   0xa   :  { %47 = vst.msk [vmem:[#allocation2 + $0x22] sm:$0x1] %vm44_vm0, %v3740_v4  ;;  %3305 = vmatprep.subr.bf16.mxu1 %v3739_v0  ;;  %v3309_v26 = vpack.c.bf16 %v2117_v25, %v2116_v24  ;;  %v2119_v30 = vld [vmem:[%s4839_s1 + $0x78] sm:$0xff]  ;;  %v2120_v34 = vld [vmem:[%s4839_s1 + $0x80] sm:$0xff]  ;;  %v2121_v35 = vld [vmem:[%s4839_s1 + $0x88] sm:$0xff] }
   0xb   :  { %66 = vst.msk [vmem:[#allocation2 + $0x1] sm:$0xff] %vm65_vm2, %v63_v17  ;;  %67 = vst.msk [vmem:[#allocation2 + $0x9] sm:$0xff] %vm65_vm2, %v64_v19  ;;  %v3312_v33 = vpack.c.bf16 %v2119_v30, %v2118_v29  ;;  %v3315_v38 = vpack.c.bf16 %v2121_v35, %v2120_v34  ;;  %v2128_v48 = vld [vmem:[%s4841_s3 + $0x80] sm:$0xff]  ;;  %v2129_v49 = vld [vmem:[%s4841_s3 + $0x88] sm:$0xff] }
   0xc   :  { %71 = vst.msk [vmem:[#allocation2 + $0x12] sm:$0xff] %vm65_vm2, %v2098_v20  ;;  %72 = vst.msk [vmem:[#allocation2 + $0x1a] sm:$0xff] %vm65_vm2, %v2099_v21  ;;  %3298 = vmatpush3.bf16.msra.mxu0 %v3297_v22  ;;  %v3318_v50 = vpack.c.bf16 %v2129_v49, %v2128_v48  ;;  %v2130_v51 = vld [vmem:[%s4841_s3 + $0x90] sm:$0xff]  ;;  %v2131_v52 = vld [vmem:[%s4841_s3 + $0x98] sm:$0xff] }
   0xd   :  { %3307 = vmatpush3.bf16.msra.mxu1 %v3306_v23  ;;  %3308 = vmatprep.subr.bf16.mxu0 %v3739_v0  ;;  %v3321_v53 = vpack.c.bf16 %v2131_v52, %v2130_v51  ;;  %v2132_v54 = vld [vmem:[%s4841_s3 + $0xa0] sm:$0xff]  ;;  %v2133_v55 = vld [vmem:[%s4841_s3 + $0xa8] sm:$0xff]  ;;  %v2134_v60 = vld [vmem:[%s4841_s3 + $0xb0] sm:$0xff] }
   0xe   :  { %3317 = vmatprep.subr.bf16.mxu1 %v3739_v0  ;;  %v455_v56 = vld [vmem:[%s4841_s3] sm:$0xff]  ;;  %v456_v57 = vld [vmem:[%s4841_s3 + $0x8] sm:$0xff]  ;;  %v3324_v58 = vpack.c.bf16 %v2133_v55, %v2132_v54  ;;  %v2135_v61 = vld [vmem:[%s4841_s3 + $0xb8] sm:$0xff] }
   0xf   :  { %v3342_v59 = vpack.c.bf16 %v456_v57, %v455_v56  ;;  %v457_v62 = vld [vmem:[%s4841_s3 + $0x10] sm:$0xff]  ;;  %v458_v63 = vld [vmem:[%s4841_s3 + $0x18] sm:$0xff]  ;;  %v3327_v1 = vpack.c.bf16 %v2135_v61, %v2134_v60  ;;  %v2136_v3 = vld [vmem:[%s4841_s3 + $0xc0] sm:$0xff] }
  0x10   :  { %v3345_v2 = vpack.c.bf16 %v458_v63, %v457_v62  ;;  %v2137_v5 = vld [vmem:[%s4841_s3 + $0xc8] sm:$0xff]  ;;  %v459_v6 = vld [vmem:[%s4841_s3 + $0x20] sm:$0xff]  ;;  %v2138_v10 = vld [vmem:[%s4841_s3 + $0xd0] sm:$0xff] }
  0x11   :  { %v310_v47 = vld [vmem:[#allocation2 + $0x22] sm:$0x1]  ;;  %v460_v7 = vld [vmem:[%s4841_s3 + $0x28] sm:$0xff]  ;;  %v3330_v8 = vpack.c.bf16 %v2137_v5, %v2136_v3  ;;  %v2139_v11 = vld [vmem:[%s4841_s3 + $0xd8] sm:$0xff] }
  0x12   :  { %v84_v27 = vld [vmem:[#allocation2 + $0x1] sm:$0xff]  ;;  %v85_v31 = vld [vmem:[#allocation2 + $0x9] sm:$0xff]  ;;  %v3348_v9 = vpack.c.bf16 %v460_v7, %v459_v6  ;;  %v462_v13 = vld [vmem:[%s4841_s3 + $0x38] sm:$0xff]  ;;  %v3333_v14 = vpack.c.bf16 %v2139_v11, %v2138_v10 }
  0x13   :  { %v73_v28 = vld [vmem:[#allocation2] sm:$0xff]  ;;  %2625 = vmatmul.mubr.msk.f32.vlgmr.msra.gmra.mrb[0].mxu0 %vm65_vm2, %v84_v27  ;;  %v74_v32 = vld [vmem:[#allocation2 + $0x8] sm:$0xff]  ;;  %v86_v36 = vld [vmem:[#allocation2 + $0x11] sm:$0xff] }
  0x14   :  { %2652 = vmatmul.mubr.msk.f32.vlgmr.msra.gmra.mrb[0].mxu1 %vm65_vm2, %v73_v28  ;;  %3310 = vmatpush3.bf16.msra.mxu0 %v3309_v26  ;;  %v75_v37 = vld [vmem:[#allocation2 + $0x10] sm:$0xff]  ;;  %v87_v39 = vld [vmem:[#allocation2 + $0x19] sm:$0xff]  ;;  %v88_v41 = vld [vmem:[#allocation2 + $0x21] sm:$0x1] }
  0x15   :  { %2627 = vmatprep.mubr.msk.f32.mxu0 %vm3741_vm1, %v3740_v4  ;;  %2654 = vmatprep.mubr.msk.f32.mxu1 %vm3741_vm1, %v3740_v4  ;;  %v76_v40 = vld [vmem:[#allocation2 + $0x18] sm:$0xff]  ;;  %v77_v42 = vld [vmem:[#allocation2 + $0x20] sm:$0x1]  ;;  %v306_v43 = vld [vmem:[#allocation2 + $0x2] sm:$0xff] }
  0x16   :  { %3311 = vmatprep.subr.bf16.mxu0 %v3739_v0  ;;  %v307_v44 = vld [vmem:[#allocation2 + $0xa] sm:$0xff]  ;;  %v308_v45 = vld [vmem:[#allocation2 + $0x12] sm:$0xff]  ;;  %v309_v46 = vld [vmem:[#allocation2 + $0x1a] sm:$0xff]  ;;  %3319 = vmatpush3.bf16.msra.mxu1 %v3318_v50 }
  0x17   :  { %2628 = vmatmul.mubr.msk.f32.gmra.mrb[2].mxu0 %vm65_vm2, %v85_v31  ;;  %3320 = vmatprep.subr.bf16.mxu1 %v3739_v0  ;;  %v461_v12 = vld [vmem:[%s4841_s3 + $0x30] sm:$0xff]  ;;  %v2140_v16 = vld [vmem:[%s4841_s3 + $0xe0] sm:$0xff]  ;;  %v2141_v17 = vld [vmem:[%s4841_s3 + $0xe8] sm:$0xff] }
  0x18   :  { %2655 = vmatmul.mubr.msk.f32.gmra.mrb[2].mxu1 %vm65_vm2, %v74_v32  ;;  %2630 = vmatprep.mubr.msk.f32.mxu0 %vm3741_vm1, %v3740_v4  ;;  %v3351_v15 = vpack.c.bf16 %v462_v13, %v461_v12  ;;  %v463_v18 = vld [vmem:[%s4841_s3 + $0x40] sm:$0xff]  ;;  %v464_v19 = vld [vmem:[%s4841_s3 + $0x48] sm:$0xff]  ;;  %v3336_v20 = vpack.c.bf16 %v2141_v17, %v2140_v16  ;;  %v2142_v22 = vld [vmem:[%s4841_s3 + $0xf0] sm:$0xff] }
  0x19   :  { %2657 = vmatprep.mubr.msk.f32.mxu1 %vm3741_vm1, %v3740_v4  ;;  %3313 = vmatpush3.bf16.msra.mxu0 %v3312_v33  ;;  %v3354_v21 = vpack.c.bf16 %v464_v19, %v463_v18  ;;  %v2143_v23 = vld [vmem:[%s4841_s3 + $0xf8] sm:$0xff]  ;;  %v465_v24 = vld [vmem:[%s4841_s3 + $0x50] sm:$0xff]  ;;  %v467_v28 = vld [vmem:[%s4841_s3 + $0x60] sm:$0xff] }
  0x1a   :  { %3314 = vmatprep.subr.bf16.mxu0 %v3739_v0  ;;  %3322 = vmatpush3.bf16.msra.mxu1 %v3321_v53  ;;  %v466_v25 = vld [vmem:[%s4841_s3 + $0x58] sm:$0xff]  ;;  %v3339_v26 = vpack.c.bf16 %v2143_v23, %v2142_v22  ;;  %v468_v29 = vld [vmem:[%s4841_s3 + $0x68] sm:$0xff]  ;;  %v469_v31 = vld [vmem:[%s4841_s3 + $0x70] sm:$0xff] }
  0x1b   :  { %2631 = vmatmul.mubr.msk.f32.gmra.mrb[4].mxu0 %vm65_vm2, %v86_v36  ;;  %3323 = vmatprep.subr.bf16.mxu1 %v3739_v0  ;;  %v3357_v27 = vpack.c.bf16 %v466_v25, %v465_v24  ;;  %v3360_v30 = vpack.c.bf16 %v468_v29, %v467_v28  ;;  %v470_v32 = vld [vmem:[%s4841_s3 + $0x78] sm:$0xff]  ;;  %v2127_v60 = vld [vmem:[%s4842_s2] ss:$0 sm:$0xff]  ;;  %v2149_v18 = vld [vmem:[%s4841_s3 + $0x128] sm:$0xff] }
  0x1c   :  { %2658 = vmatmul.mubr.msk.f32.gmra.mrb[4].mxu1 %vm65_vm2, %v75_v37  ;;  %2633 = vmatprep.mubr.msk.f32.mxu0 %vm3741_vm1, %v3740_v4  ;;  %v3363_v33 = vpack.c.bf16 %v470_v32, %v469_v31  ;;  %v2144_v63 = vld [vmem:[%s4841_s3 + $0x100] sm:$0xff]  ;;  %v2147_v10 = vld [vmem:[%s4841_s3 + $0x118] sm:$0xff]  ;;  %v2150_v25 = vld [vmem:[%s4841_s3 + $0x130] sm:$0xff] }
  0x1d   :  { %2660 = vmatprep.mubr.msk.f32.mxu1 %vm3741_vm1, %v3740_v4  ;;  %3316 = vmatpush3.bf16.msra.mxu0 %v3315_v38  ;;  %v2148_v17 = vld [vmem:[%s4841_s3 + $0x120] sm:$0xff] }
  0x1e   :  { %3341 = vmatprep.subr.bf16.mxu0 %v3739_v0  ;;  %3325 = vmatpush3.bf16.msra.mxu1 %v3324_v58 }
  0x1f   :  { %2634 = vmatmul.mubr.msk.f32.gmra.mrb[6].mxu0 %vm65_vm2, %v87_v39  ;;  %3326 = vmatprep.subr.bf16.mxu1 %v3739_v0 }
  0x20   :  { %2661 = vmatmul.mubr.msk.f32.gmra.mrb[6].mxu1 %vm65_vm2, %v76_v40  ;;  %2636 = vmatprep.mubr.msk.f32.mxu0 %vm3741_vm1, %v3740_v4 }
  0x21   :  { %2663 = vmatprep.mubr.msk.f32.mxu1 %vm3741_vm1, %v3740_v4 }
  0x22   :  { %3328 = vmatpush3.bf16.msra.mxu1 %v3327_v1  ;;  %v2145_v1 = vld [vmem:[%s4841_s3 + $0x108] sm:$0xff] }
  0x23   :  { %2637 = vmatmul.mubr.msk.f32.gmra.mrb[8].mxu0 %vm65_vm2, %v88_v41  ;;  %3329 = vmatprep.subr.bf16.mxu1 %v3739_v0  ;;  %v3366_v5 = vpack.c.bf16 %v2145_v1, %v2144_v63  ;;  %v833_v63 = vld [vmem:[%s4843_s5 + $0x8] sm:$0xff]  ;;  %v2163_v1 = vld [vmem:[%s4843_s5 + $0x90] sm:$0xff] }
  0x24   :  { %2664 = vmatmul.mubr.msk.f32.gmra.mrb[8].mxu1 %vm65_vm2, %v77_v42  ;;  %2678 = vmatprep.mubr.msk.f32.mxu0 %vm3741_vm1, %v3740_v4 }
  0x25   :  { %2725 = vmatprep.mubr.msk.f32.mxu1 %vm3741_vm1, %v3740_v4 }
  0x26   :  { %3331 = vmatpush3.bf16.msra.mxu1 %v3330_v8 }
  0x27   :  { %2679 = vmatmul.mubr.msk.f32.vlgmr.msra.gmra.mrb[10].mxu0 %vm65_vm2, %v306_v43  ;;  %3332 = vmatprep.subr.bf16.mxu1 %v3739_v0 }
  0x28   :  { %2681 = vmatprep.mubr.msk.f32.mxu0 %vm3741_vm1, %v3740_v4  ;;  %3343 = vmatpush3.bf16.msra.mxu0 %v3342_v59 }
  0x29   :  { %3344 = vmatprep.subr.bf16.mxu0 %v3739_v0 }
  0x2a   :  { %3334 = vmatpush3.bf16.msra.mxu1 %v3333_v14 }
  0x2b   :  { %2682 = vmatmul.mubr.msk.f32.gmra.mrb[12].mxu0 %vm65_vm2, %v307_v44  ;;  %3335 = vmatprep.subr.bf16.mxu1 %v3739_v0 }
  0x2c   :  { %2684 = vmatprep.mubr.msk.f32.mxu0 %vm3741_vm1, %v3740_v4  ;;  %3346 = vmatpush3.bf16.msra.mxu0 %v3345_v2 }
  0x2d   :  { %3347 = vmatprep.subr.bf16.mxu0 %v3739_v0 }
  0x2e   :  { %3337 = vmatpush3.bf16.msra.mxu1 %v3336_v20 }
  0x2f   :  { %2685 = vmatmul.mubr.msk.f32.gmra.mrb[14].mxu0 %vm65_vm2, %v308_v45  ;;  %3338 = vmatprep.subr.bf16.mxu1 %v3739_v0 }
  0x30   :  { %2687 = vmatprep.mubr.msk.f32.mxu0 %vm3741_vm1, %v3740_v4  ;;  %3349 = vmatpush3.bf16.msra.mxu0 %v3348_v9  ;;  %v2146_v9 = vld [vmem:[%s4841_s3 + $0x110] sm:$0xff] }
  0x31   :  { %3350 = vmatprep.subr.bf16.mxu0 %v3739_v0  ;;  %v3369_v13 = vpack.c.bf16 %v2147_v10, %v2146_v9  ;;  %v2165_v9 = vld [vmem:[%s4843_s5 + $0xa0] sm:$0xff]  ;;  %v2166_v10 = vld [vmem:[%s4843_s5 + $0xa8] sm:$0xff] }
  0x32   :  { %3340 = vmatpush3.bf16.msra.mxu1 %v3339_v26  ;;  %v2151_v26 = vld [vmem:[%s4841_s3 + $0x138] sm:$0xff] }
  0x33   :  { %2688 = vmatmul.mubr.msk.f32.gmra.mrb[16].mxu0 %vm65_vm2, %v309_v46  ;;  %3365 = vmatprep.subr.bf16.mxu1 %v3739_v0 }
  0x34   :  { %2690 = vmatprep.mubr.msk.f32.mxu0 %vm3741_vm1, %v3740_v4  ;;  %3352 = vmatpush3.bf16.msra.mxu0 %v3351_v15 }
  0x35   :  { %3353 = vmatprep.subr.bf16.mxu0 %v3739_v0 }
  0x37   :  { %2691 = vmatmul.mubr.msk.f32.gmra.mrb[18].mxu0 %vm65_vm2, %v310_v47 }
  0x38   :  { %2772 = vmatprep.mubr.msk.f32.mxu0 %vm3741_vm1, %v3740_v4  ;;  %3355 = vmatpush3.bf16.msra.mxu0 %v3354_v21  ;;  %v3372_v21 = vpack.c.bf16 %v2149_v18, %v2148_v17  ;;  %v838_v17 = vld [vmem:[%s4843_s5 + $0x30] sm:$0xff]  ;;  %v839_v18 = vld [vmem:[%s4843_s5 + $0x38] sm:$0xff] }
  0x39   :  { %3356 = vmatprep.subr.bf16.mxu0 %v3739_v0 }
  0x3c   :  { %3358 = vmatpush3.bf16.msra.mxu0 %v3357_v27 }
  0x3d   :  { %3359 = vmatprep.subr.bf16.mxu0 %v3739_v0 }
  0x40   :  { %3361 = vmatpush3.bf16.msra.mxu0 %v3360_v30  ;;  %v3375_v30 = vpack.c.bf16 %v2151_v26, %v2150_v25 }
  0x41   :  { %3362 = vmatprep.subr.bf16.mxu0 %v3739_v0 }
  0x44   :  { %3364 = vmatpush3.bf16.msra.mxu0 %v3363_v33 }
  0x45   :  { %3389 = vmatprep.subr.bf16.mxu0 %v3739_v0 }
  0xe6   :  { %v177_v34 = vpop.f32.mrb[0].mxu0 }
  0xe7   :  { %v2626_v35 = vpop.f32.mrb[1].mxu0  ;;  %v282_v36 = vpop.f32.mrb[0].mxu1 }
  0xe8   :  { %v283_v37 = vadd.f32 %v282_v36, %v177_v34  ;;  %v2653_v38 = vpop.f32.mrb[1].mxu1  ;;  %v2152_v35 = vld [vmem:[%s4841_s3 + $0x140] sm:$0xff]  ;;  %v2153_v36 = vld [vmem:[%s4841_s3 + $0x148] sm:$0xff] }
  0xea   :  { %v182_v39 = vpop.f32.mrb[2].mxu0 }
  0xeb   :  { %v2629_v40 = vpop.f32.mrb[3].mxu0  ;;  %v287_v41 = vpop.f32.mrb[2].mxu1 }
  0xec   :  { %v288_v42 = vadd.f32 %v287_v41, %v182_v39  ;;  %v2656_v43 = vpop.f32.mrb[3].mxu1  ;;  %v3378_v39 = vpack.c.bf16 %v2153_v36, %v2152_v35  ;;  %v2154_v40 = vld [vmem:[%s4841_s3 + $0x150] sm:$0xff] }
  0xed   :  { %v2155_v43 = vld [vmem:[%s4841_s3 + $0x158] sm:$0xff] }
  0xee   :  { %v187_v44 = vpop.f32.mrb[4].mxu0 }
  0xef   :  { %v2632_v45 = vpop.f32.mrb[5].mxu0  ;;  %v292_v46 = vpop.f32.mrb[4].mxu1 }
  0xf0   :  { %v293_v47 = vadd.f32 %v292_v46, %v187_v44  ;;  %v2659_v48 = vpop.f32.mrb[5].mxu1  ;;  %v3381_v44 = vpack.c.bf16 %v2155_v43, %v2154_v40  ;;  %v2156_v46 = vld [vmem:[%s4841_s3 + $0x160] sm:$0xff] }
  0xf2   :  { %v192_v49 = vpop.f32.mrb[6].mxu0 }
  0xf3   :  { %v2635_v50 = vpop.f32.mrb[7].mxu0  ;;  %v297_v51 = vpop.f32.mrb[6].mxu1 }
  0xf4   :  { %v298_v52 = vadd.f32 %v297_v51, %v192_v49  ;;  %v2662_v53 = vpop.f32.mrb[7].mxu1  ;;  %v2158_v49 = vld [vmem:[%s4841_s3 + $0x170] sm:$0xff] }
  0xf6   :  { %v197_v54 = vpop.f32.mrb[8].mxu0 }
  0xf7   :  { %v2638_v55 = vpop.f32.mrb[9].mxu0  ;;  %v302_v56 = vpop.f32.mrb[8].mxu1 }
  0xf8   :  { %v303_v57 = vadd.f32 %v302_v56, %v197_v54  ;;  %v2665_v58 = vpop.f32.mrb[9].mxu1 }
  0xf9   :  { %v677_v58 = vld [vmem:[#allocation3 + $0x22] sm:$0x1] }
  0xfa   :  { %v399_v59 = vpop.f32.mrb[10].mxu0 }
  0xfb   :  { %v423_v61 = vadd.f32 %v399_v59, %v283_v37  ;;  %v2680_v62 = vpop.f32.mrb[11].mxu0  ;;  %v2161_v59 = vld [vmem:[%s4843_s5 + $0x80] sm:$0xff] }
  0xfd   :  { %v435_v2 = vadd.f32 %v2127_v60, %v423_v61  ;;  %v832_v61 = vld [vmem:[%s4843_s5] sm:$0xff] }
  0xfe   :  { %v404_v3 = vpop.f32.mrb[12].mxu0 }
  0xff   :  { %v440_v6 = vmax.f32 %v435_v2, 0.0  ;;  %v424_v7 = vadd.f32 %v404_v3, %v288_v42  ;;  %v2683_v8 = vpop.f32.mrb[13].mxu0  ;;  %v2164_v2 = vld [vmem:[%s4843_s5 + $0x98] sm:$0xff]  ;;  %v3414_v3 = vpack.c.bf16 %v833_v63, %v832_v61  ;;  %v2160_v61 = vld [vmem:[%s4844_s4] ss:$0 sm:$0xff] }
 0x101   :  { %445 = vst [vmem:[#allocation3 + $0x1] sm:$0xff] %v440_v6  ;;  %v436_v11 = vadd.f32 %v2127_v60, %v424_v7  ;;  %2726 = vmatmul.mubr.f32.vlgmr.msra.gmra.mrb[10].mxu1 %v440_v6  ;;  %v835_v6 = vld [vmem:[%s4843_s5 + $0x18] sm:$0xff]  ;;  %v3393_v7 = vpack.c.bf16 %v2164_v2, %v2163_v1 }
 0x102   :  { %v409_v12 = vpop.f32.mrb[14].mxu0  ;;  %3367 = vmatpush3.bf16.msra.mxu1 %v3366_v5  ;;  %2728 = vmatprep.mubr.msk.f32.mxu1 %vm3741_vm1, %v3740_v4  ;;  %v834_v5 = vld [vmem:[%s4843_s5 + $0x10] sm:$0xff] }
 0x103   :  { %v441_v14 = vmax.f32 %v436_v11, 0.0  ;;  %v425_v15 = vadd.f32 %v409_v12, %v293_v47  ;;  %v2686_v16 = vpop.f32.mrb[15].mxu0  ;;  %3368 = vmatprep.subr.bf16.mxu1 %v3739_v0  ;;  %v2157_v47 = vld [vmem:[%s4841_s3 + $0x168] sm:$0xff]  ;;  %v3417_v8 = vpack.c.bf16 %v835_v6, %v834_v5  ;;  %v836_v11 = vld [vmem:[%s4843_s5 + $0x20] sm:$0xff]  ;;  %v2176_v5 = vld [vmem:[%s4843_s5 + $0xf8] sm:$0xff] }
 0x104   :  { %v3384_v48 = vpack.c.bf16 %v2157_v47, %v2156_v46  ;;  %v837_v12 = vld [vmem:[%s4843_s5 + $0x28] sm:$0xff]  ;;  %v2168_v16 = vld [vmem:[%s4843_s5 + $0xb8] sm:$0xff] }
 0x105   :  { %446 = vst [vmem:[#allocation3 + $0x9] sm:$0xff] %v441_v14  ;;  %v437_v19 = vadd.f32 %v2127_v60, %v425_v15  ;;  %2729 = vmatmul.mubr.f32.gmra.mrb[12].mxu1 %v441_v14  ;;  %v3420_v14 = vpack.c.bf16 %v837_v12, %v836_v11  ;;  %v2167_v15 = vld [vmem:[%s4843_s5 + $0xb0] sm:$0xff] }
 0x106   :  { %v414_v20 = vpop.f32.mrb[16].mxu0  ;;  %3370 = vmatpush3.bf16.msra.mxu1 %v3369_v13  ;;  %2731 = vmatprep.mubr.msk.f32.mxu1 %vm3741_vm1, %v3740_v4  ;;  %v3396_v13 = vpack.c.bf16 %v2166_v10, %v2165_v9 }
 0x107   :  { %v442_v22 = vmax.f32 %v437_v19, 0.0  ;;  %v426_v23 = vadd.f32 %v414_v20, %v298_v52  ;;  %v2689_v24 = vpop.f32.mrb[17].mxu0  ;;  %3371 = vmatprep.subr.bf16.mxu1 %v3739_v0  ;;  %v2159_v52 = vld [vmem:[%s4841_s3 + $0x178] sm:$0xff]  ;;  %v3399_v19 = vpack.c.bf16 %v2168_v16, %v2167_v15  ;;  %v3423_v20 = vpack.c.bf16 %v839_v18, %v838_v17 }
 0x108   :  { %v450_v27 = vld [vmem:[#allocation3] sm:$0xff]  ;;  %v3387_v53 = vpack.c.bf16 %v2159_v52, %v2158_v49 }
 0x109   :  { %447 = vst [vmem:[#allocation3 + $0x11] sm:$0xfe] %v442_v22  ;;  %v438_v28 = vadd.f32 %v2127_v60, %v426_v23  ;;  %2773 = vmatmul.mubr.f32.vlgmr.msra.gmra.mrb[20].mxu0 %v450_v27  ;;  %v2170_v22 = vld [vmem:[%s4843_s5 + $0xc8] sm:$0xff]  ;;  %v840_v23 = vld [vmem:[%s4843_s5 + $0x40] sm:$0xff]  ;;  %v2171_v27 = vld [vmem:[%s4843_s5 + $0xd0] sm:$0xff] }
 0x10a   :  { %v419_v29 = vpop.f32.mrb[18].mxu0  ;;  %2775 = vmatprep.mubr.msk.f32.mxu0 %vm3741_vm1, %v3740_v4  ;;  %3373 = vmatpush3.bf16.msra.mxu1 %v3372_v21  ;;  %v2169_v21 = vld [vmem:[%s4843_s5 + $0xc0] sm:$0xff]  ;;  %v841_v24 = vld [vmem:[%s4843_s5 + $0x48] sm:$0xff] }
 0x10b   :  { %v443_v31 = vmax.f32 %v438_v28, 0.0  ;;  %v427_v32 = vadd.f32 %v419_v29, %v303_v57  ;;  %3374 = vmatprep.subr.bf16.mxu1 %v3739_v0  ;;  %v2692_v33 = vpop.f32.mrb[19].mxu0  ;;  %v3402_v25 = vpack.c.bf16 %v2170_v22, %v2169_v21  ;;  %v3426_v26 = vpack.c.bf16 %v841_v24, %v840_v23  ;;  %v2172_v28 = vld [vmem:[%s4843_s5 + $0xd8] sm:$0xff]  ;;  %v842_v29 = vld [vmem:[%s4843_s5 + $0x50] sm:$0xff] }
 0x10c   :  { %v451_v34 = vld [vmem:[#allocation3 + $0x8] sm:$0xff] }
 0x10d   :  { %448 = vst [vmem:[#allocation3 + $0x19] sm:$0xff] %v443_v31  ;;  %v439_v37 = vadd.f32 %v2127_v60, %v427_v32  ;;  %2776 = vmatmul.mubr.f32.gmra.mrb[22].mxu0 %v451_v34  ;;  %v673_v54 = vld [vmem:[#allocation3 + $0x2] sm:$0xff]  ;;  %v674_v55 = vld [vmem:[#allocation3 + $0xa] sm:$0xff] }
 0x10e   :  { %2778 = vmatprep.mubr.msk.f32.mxu0 %vm3741_vm1, %v3740_v4  ;;  %3376 = vmatpush3.bf16.msra.mxu1 %v3375_v30  ;;  %v2162_v60 = vld [vmem:[%s4843_s5 + $0x88] sm:$0xff]  ;;  %v843_v30 = vld [vmem:[%s4843_s5 + $0x58] sm:$0xff] }
 0x10f   :  { %v444_v38 = vmax.f32 %v439_v37, 0.0  ;;  %3377 = vmatprep.subr.bf16.mxu1 %v3739_v0  ;;  %v3390_v62 = vpack.c.bf16 %v2162_v60, %v2161_v59  ;;  %v3429_v32 = vpack.c.bf16 %v843_v30, %v842_v29  ;;  %v2174_v59 = vld [vmem:[%s4843_s5 + $0xe8] sm:$0xff] }
 0x110   :  { %v473_v41 = vld [vmem:[#allocation3 + $0x11] sm:$0xff] }
 0x111   :  { %v452_v42 = vld [vmem:[#allocation3 + $0x10] sm:$0xff]  ;;  %449 = vst [vmem:[#allocation3 + $0x21] sm:$0x1] %v444_v38  ;;  %2732 = vmatmul.mubr.f32.gmra.mrb[14].mxu1 %v473_v41  ;;  %3391 = vmatpush3.bf16.msra.mxu0 %v3390_v62 }
 0x112   :  { %2779 = vmatmul.mubr.f32.gmra.mrb[24].mxu0 %v452_v42  ;;  %2734 = vmatprep.mubr.msk.f32.mxu1 %vm3741_vm1, %v3740_v4 }
 0x113   :  { %2781 = vmatprep.mubr.msk.f32.mxu0 %vm3741_vm1, %v3740_v4  ;;  %3379 = vmatpush3.bf16.msra.mxu1 %v3378_v39 }
 0x114   :  { %v453_v45 = vld [vmem:[#allocation3 + $0x18] sm:$0xff]  ;;  %3380 = vmatprep.subr.bf16.mxu1 %v3739_v0  ;;  %v454_v51 = vld [vmem:[#allocation3 + $0x20] sm:$0x1]  ;;  %3392 = vmatprep.subr.bf16.mxu0 %v3739_v0 }
 0x115   :  { %2735 = vmatmul.mubr.f32.gmra.mrb[16].mxu1 %v443_v31  ;;  %v675_v56 = vld [vmem:[#allocation3 + $0x12] sm:$0xff]  ;;  %3394 = vmatpush3.bf16.msra.mxu0 %v3393_v7  ;;  %v3405_v31 = vpack.c.bf16 %v2172_v28, %v2171_v27 }
 0x116   :  { %2782 = vmatmul.mubr.f32.gmra.mrb[26].mxu0 %v453_v45  ;;  %2737 = vmatprep.mubr.msk.f32.mxu1 %vm3741_vm1, %v3740_v4 }
 0x117   :  { %2784 = vmatprep.mubr.msk.f32.mxu0 %vm3741_vm1, %v3740_v4  ;;  %3382 = vmatpush3.bf16.msra.mxu1 %v3381_v44 }
 0x118   :  { %v475_v50 = vld [vmem:[#allocation3 + $0x21] sm:$0x1]  ;;  %3383 = vmatprep.subr.bf16.mxu1 %v3739_v0  ;;  %3395 = vmatprep.subr.bf16.mxu0 %v3739_v0 }
 0x119   :  { %2738 = vmatmul.mubr.f32.gmra.mrb[18].mxu1 %v475_v50  ;;  %v676_v57 = vld [vmem:[#allocation3 + $0x1a] sm:$0xff]  ;;  %3397 = vmatpush3.bf16.msra.mxu0 %v3396_v13 }
 0x11a   :  { %2785 = vmatmul.mubr.f32.gmra.mrb[28].mxu0 %v454_v51  ;;  %2819 = vmatprep.mubr.msk.f32.mxu1 %vm3741_vm1, %v3740_v4  ;;  %v844_v13 = vld [vmem:[%s4843_s5 + $0x60] sm:$0xff] }
 0x11b   :  { %2866 = vmatprep.mubr.msk.f32.mxu0 %vm3741_vm1, %v3740_v4  ;;  %3385 = vmatpush3.bf16.msra.mxu1 %v3384_v48 }
 0x11c   :  { %3386 = vmatprep.subr.bf16.mxu1 %v3739_v0  ;;  %3398 = vmatprep.subr.bf16.mxu0 %v3739_v0 }
 0x11d   :  { %3400 = vmatpush3.bf16.msra.mxu0 %v3399_v19  ;;  %v846_v19 = vld [vmem:[%s4843_s5 + $0x70] sm:$0xff] }
 0x11e   :  { %3401 = vmatprep.subr.bf16.mxu0 %v3739_v0 }
 0x11f   :  { %3388 = vmatpush3.bf16.msra.mxu1 %v3387_v53 }
 0x120   :  { %3413 = vmatprep.subr.bf16.mxu1 %v3739_v0 }
 0x121   :  { %3403 = vmatpush3.bf16.msra.mxu0 %v3402_v25 }
 0x122   :  { %2820 = vmatmul.mubr.f32.vlgmr.msra.gmra.mrb[20].mxu1 %v673_v54  ;;  %3404 = vmatprep.subr.bf16.mxu0 %v3739_v0 }
 0x123   :  { %2822 = vmatprep.mubr.msk.f32.mxu1 %vm3741_vm1, %v3740_v4  ;;  %3415 = vmatpush3.bf16.msra.mxu1 %v3414_v3  ;;  %v2175_v3 = vld [vmem:[%s4843_s5 + $0xf0] sm:$0xff] }
 0x124   :  { %3416 = vmatprep.subr.bf16.mxu1 %v3739_v0  ;;  %v3411_v7 = vpack.c.bf16 %v2176_v5, %v2175_v3  ;;  %v2190_v3 = vld [vmem:[%s4843_s5 + $0x168] sm:$0xff] }
 0x125   :  { %3406 = vmatpush3.bf16.msra.mxu0 %v3405_v31 }
 0x126   :  { %2823 = vmatmul.mubr.f32.gmra.mrb[22].mxu1 %v674_v55  ;;  %3407 = vmatprep.subr.bf16.mxu0 %v3739_v0 }
 0x127   :  { %2825 = vmatprep.mubr.msk.f32.mxu1 %vm3741_vm1, %v3740_v4  ;;  %3418 = vmatpush3.bf16.msra.mxu1 %v3417_v8 }
 0x128   :  { %3419 = vmatprep.subr.bf16.mxu1 %v3739_v0 }
 0x12a   :  { %2826 = vmatmul.mubr.f32.gmra.mrb[24].mxu1 %v675_v56 }
 0x12b   :  { %2828 = vmatprep.mubr.msk.f32.mxu1 %vm3741_vm1, %v3740_v4  ;;  %3421 = vmatpush3.bf16.msra.mxu1 %v3420_v14  ;;  %v845_v14 = vld [vmem:[%s4843_s5 + $0x68] sm:$0xff] }
 0x12c   :  { %3422 = vmatprep.subr.bf16.mxu1 %v3739_v0  ;;  %v3432_v18 = vpack.c.bf16 %v845_v14, %v844_v13  ;;  %v2194_v13 = vld [vmem:[%s4845_s7 + $0x80] sm:$0xff]  ;;  %v2195_v14 = vld [vmem:[%s4845_s7 + $0x88] sm:$0xff] }
 0x12e   :  { %2829 = vmatmul.mubr.f32.gmra.mrb[26].mxu1 %v676_v57 }
 0x12f   :  { %2831 = vmatprep.mubr.msk.f32.mxu1 %vm3741_vm1, %v3740_v4  ;;  %3424 = vmatpush3.bf16.msra.mxu1 %v3423_v20  ;;  %v847_v20 = vld [vmem:[%s4843_s5 + $0x78] sm:$0xff] }
 0x130   :  { %3425 = vmatprep.subr.bf16.mxu1 %v3739_v0  ;;  %v3435_v22 = vpack.c.bf16 %v847_v20, %v846_v19  ;;  %v2198_v19 = vld [vmem:[%s4845_s7 + $0xa0] sm:$0xff]  ;;  %v2199_v20 = vld [vmem:[%s4845_s7 + $0xa8] sm:$0xff] }
 0x132   :  { %2832 = vmatmul.mubr.f32.gmra.mrb[28].mxu1 %v677_v58  ;;  %v2173_v58 = vld [vmem:[%s4843_s5 + $0xe0] sm:$0xff] }
 0x133   :  { %2907 = vmatprep.mubr.msk.f32.mxu1 %vm3741_vm1, %v3740_v4  ;;  %3427 = vmatpush3.bf16.msra.mxu1 %v3426_v26  ;;  %v3408_v62 = vpack.c.bf16 %v2174_v59, %v2173_v58  ;;  %v2186_v58 = vld [vmem:[%s4843_s5 + $0x148] sm:$0xff] }
 0x134   :  { %3428 = vmatprep.subr.bf16.mxu1 %v3739_v0 }
 0x135   :  { %3409 = vmatpush3.bf16.msra.mxu0 %v3408_v62 }
 0x136   :  { %3410 = vmatprep.subr.bf16.mxu0 %v3739_v0 }
 0x137   :  { %3430 = vmatpush3.bf16.msra.mxu1 %v3429_v32 }
 0x138   :  { %3431 = vmatprep.subr.bf16.mxu1 %v3739_v0 }
 0x139   :  { %3412 = vmatpush3.bf16.msra.mxu0 %v3411_v7 }
 0x13a   :  { %3437 = vmatprep.subr.bf16.mxu0 %v3739_v0 }
 0x13b   :  { %3433 = vmatpush3.bf16.msra.mxu1 %v3432_v18 }
 0x13c   :  { %3434 = vmatprep.subr.bf16.mxu1 %v3739_v0 }
 0x13f   :  { %3436 = vmatpush3.bf16.msra.mxu1 %v3435_v22  ;;  %v1151_v22 = vld [vmem:[%s4845_s7 + $0x8] sm:$0xff] }
 0x140   :  { %3461 = vmatprep.subr.bf16.mxu1 %v3739_v0 }
 0x1d4   :  { %v559_v33 = vpop.f32.mrb[10].mxu1 }
 0x1d5   :  { %v2727_v34 = vpop.f32.mrb[11].mxu1 }
 0x1d8   :  { %v564_v35 = vpop.f32.mrb[12].mxu1 }
 0x1d9   :  { %v2730_v36 = vpop.f32.mrb[13].mxu1 }
 0x1dc   :  { %v649_v37 = vpop.f32.mrb[20].mxu0 }
 0x1dd   :  { %v650_v38 = vadd.f32 %v649_v37, %v559_v33  ;;  %v2774_v39 = vpop.f32.mrb[21].mxu0 }
 0x1e0   :  { %v654_v40 = vpop.f32.mrb[22].mxu0 }
 0x1e1   :  { %v655_v41 = vadd.f32 %v654_v40, %v564_v35  ;;  %v2777_v42 = vpop.f32.mrb[23].mxu0  ;;  %v2177_v40 = vld [vmem:[%s4843_s5 + $0x100] sm:$0xff] }
 0x1e4   :  { %v569_v43 = vpop.f32.mrb[14].mxu1 }
 0x1e5   :  { %v659_v44 = vpop.f32.mrb[24].mxu0  ;;  %v2733_v46 = vpop.f32.mrb[15].mxu1 }
 0x1e6   :  { %v660_v45 = vadd.f32 %v659_v44, %v569_v43  ;;  %v2780_v47 = vpop.f32.mrb[25].mxu0  ;;  %v2180_v46 = vld [vmem:[%s4843_s5 + $0x118] sm:$0xff] }
 0x1e8   :  { %v574_v48 = vpop.f32.mrb[16].mxu1 }
 0x1e9   :  { %v664_v49 = vpop.f32.mrb[26].mxu0  ;;  %v2736_v51 = vpop.f32.mrb[17].mxu1 }
 0x1ea   :  { %v665_v50 = vadd.f32 %v664_v49, %v574_v48  ;;  %v2783_v52 = vpop.f32.mrb[27].mxu0  ;;  %v2181_v48 = vld [vmem:[%s4843_s5 + $0x120] sm:$0xff]  ;;  %v2182_v49 = vld [vmem:[%s4843_s5 + $0x128] sm:$0xff]  ;;  %v2183_v51 = vld [vmem:[%s4843_s5 + $0x130] sm:$0xff] }
 0x1eb   :  { %v2184_v52 = vld [vmem:[%s4843_s5 + $0x138] sm:$0xff] }
 0x1ec   :  { %v579_v53 = vpop.f32.mrb[18].mxu1 }
 0x1ed   :  { %v669_v54 = vpop.f32.mrb[28].mxu0  ;;  %v2739_v56 = vpop.f32.mrb[19].mxu1 }
 0x1ee   :  { %v670_v55 = vadd.f32 %v669_v54, %v579_v53  ;;  %v2786_v57 = vpop.f32.mrb[29].mxu0 }
 0x1ef   :  { %v2185_v57 = vld [vmem:[%s4843_s5 + $0x140] sm:$0xff] }
 0x1f0   :  { %v3450_v59 = vpack.c.bf16 %v2186_v58, %v2185_v57  ;;  %v1164_v58 = vld [vmem:[%s4845_s7 + $0x70] sm:$0xff] }
 0x1f5   :  { %v761_v60 = vpop.f32.mrb[20].mxu1 }
 0x1f6   :  { %v785_v63 = vadd.f32 %v761_v60, %v650_v38  ;;  %v2821_v1 = vpop.f32.mrb[21].mxu1  ;;  %v2187_v60 = vld [vmem:[%s4843_s5 + $0x150] sm:$0xff] }
 0x1f8   :  { %v797_v2 = vadd.f32 %v2160_v61, %v785_v63  ;;  %v2189_v63 = vld [vmem:[%s4843_s5 + $0x160] sm:$0xff] }
 0x1f9   :  { %v766_v6 = vpop.f32.mrb[22].mxu1  ;;  %v3456_v5 = vpack.c.bf16 %v2190_v3, %v2189_v63 }
 0x1fa   :  { %v802_v8 = vmax.f32 %v797_v2, 0.0  ;;  %v786_v9 = vadd.f32 %v766_v6, %v655_v41  ;;  %v2824_v10 = vpop.f32.mrb[23].mxu1  ;;  %v2178_v41 = vld [vmem:[%s4843_s5 + $0x108] sm:$0xff]  ;;  %v2191_v6 = vld [vmem:[%s4843_s5 + $0x170] sm:$0xff] }
 0x1fb   :  { %v3438_v43 = vpack.c.bf16 %v2178_v41, %v2177_v40  ;;  %v2205_v41 = vld [vmem:[%s4845_s7 + $0xd8] sm:$0xff] }
 0x1fc   :  { %807 = vst [vmem:[#allocation4] sm:$0xff] %v802_v8  ;;  %v798_v11 = vadd.f32 %v2160_v61, %v786_v9  ;;  %v2192_v9 = vld [vmem:[%s4843_s5 + $0x178] sm:$0xff] }
 0x1fd   :  { %v771_v12 = vpop.f32.mrb[24].mxu1  ;;  %v3459_v10 = vpack.c.bf16 %v2192_v9, %v2191_v6 }
 0x1fe   :  { %v803_v15 = vmax.f32 %v798_v11, 0.0  ;;  %v787_v16 = vadd.f32 %v771_v12, %v660_v45  ;;  %v2827_v17 = vpop.f32.mrb[25].mxu1  ;;  %v2179_v45 = vld [vmem:[%s4843_s5 + $0x110] sm:$0xff]  ;;  %v1030_v12 = vld [vmem:[#allocation5 + $0x12] sm:$0x1] }
 0x1ff   :  { %v3441_v47 = vpack.c.bf16 %v2180_v46, %v2179_v45  ;;  %v2197_v17 = vld [vmem:[%s4845_s7 + $0x98] sm:$0xff]  ;;  %v1158_v45 = vld [vmem:[%s4845_s7 + $0x40] sm:$0xff]  ;;  %v1159_v46 = vld [vmem:[%s4845_s7 + $0x48] sm:$0xff] }
 0x200   :  { %808 = vst [vmem:[#allocation4 + $0x8] sm:$0xff] %v803_v15  ;;  %v799_v21 = vadd.f32 %v2160_v61, %v787_v16  ;;  %v3462_v15 = vpack.c.bf16 %v2195_v14, %v2194_v13  ;;  %v2196_v16 = vld [vmem:[%s4845_s7 + $0x90] sm:$0xff] }
 0x201   :  { %v776_v23 = vpop.f32.mrb[26].mxu1  ;;  %v3465_v18 = vpack.c.bf16 %v2197_v17, %v2196_v16 }
 0x202   :  { %v804_v24 = vmax.f32 %v799_v21, 0.0  ;;  %v788_v25 = vadd.f32 %v776_v23, %v665_v50  ;;  %v2830_v26 = vpop.f32.mrb[27].mxu1  ;;  %v3444_v50 = vpack.c.bf16 %v2182_v49, %v2181_v48  ;;  %v1150_v21 = vld [vmem:[%s4845_s7] sm:$0xff]  ;;  %v3468_v23 = vpack.c.bf16 %v2199_v20, %v2198_v19  ;;  %v2208_v49 = vld [vmem:[%s4845_s7 + $0xf0] sm:$0xff]  ;;  %v2211_v19 = vld [vmem:[%s4845_s7 + $0x108] sm:$0xff] }
 0x203   :  { %v2201_v26 = vld [vmem:[%s4845_s7 + $0xb8] sm:$0xff]  ;;  %v3498_v48 = vpack.c.bf16 %v1159_v46, %v1158_v45  ;;  %v2219_v46 = vld [vmem:[%s4845_s7 + $0x148] sm:$0xff] }
 0x204   :  { %809 = vst [vmem:[#allocation4 + $0xf] sm:$0xfe] %v804_v24  ;;  %v800_v27 = vadd.f32 %v2160_v61, %v788_v25  ;;  %v3486_v24 = vpack.c.bf16 %v1151_v22, %v1150_v21  ;;  %v2200_v25 = vld [vmem:[%s4845_s7 + $0xb0] sm:$0xff] }
 0x205   :  { %v781_v28 = vpop.f32.mrb[28].mxu1 }
 0x206   :  { %v805_v29 = vmax.f32 %v800_v27, 0.0  ;;  %v789_v30 = vadd.f32 %v781_v28, %v670_v55  ;;  %v2833_v31 = vpop.f32.mrb[29].mxu1  ;;  %v3447_v55 = vpack.c.bf16 %v2184_v52, %v2183_v51  ;;  %v1152_v27 = vld [vmem:[%s4845_s7 + $0x10] sm:$0xff]  ;;  %v1153_v28 = vld [vmem:[%s4845_s7 + $0x18] sm:$0xff] }
 0x207   :  { %v812_v32 = vld [vmem:[#allocation4] ss:$2 sm:$0xff]  ;;  %v814_v33 = vld [vmem:[#allocation4 + $0x1] ss:$2 sm:$0xff]  ;;  %v2202_v31 = vld [vmem:[%s4845_s7 + $0xc0] sm:$0xff] }
 0x208   :  { %810 = vst [vmem:[#allocation4 + $0x17] sm:$0xff] %v805_v29  ;;  %v801_v34 = vadd.f32 %v2160_v61, %v789_v30  ;;  %v815_v35 = vmax.f32 %v812_v32, %v814_v33  ;;  %v2188_v61 = vld [vmem:[%s4843_s5 + $0x158] sm:$0xff]  ;;  %v3471_v29 = vpack.c.bf16 %v2201_v26, %v2200_v25  ;;  %v3489_v30 = vpack.c.bf16 %v1153_v28, %v1152_v27  ;;  %v2203_v32 = vld [vmem:[%s4845_s7 + $0xc8] sm:$0xff]  ;;  %v1154_v33 = vld [vmem:[%s4845_s7 + $0x20] sm:$0xff] }
 0x209   :  { %v3453_v62 = vpack.c.bf16 %v2188_v61, %v2187_v60  ;;  %v1160_v51 = vld [vmem:[%s4845_s7 + $0x50] sm:$0xff]  ;;  %v1161_v52 = vld [vmem:[%s4845_s7 + $0x58] sm:$0xff] }
 0x20a   :  { %v806_v36 = vmax.f32 %v801_v34, 0.0  ;;  %816 = vrot.lane.b32.xlu0 %v815_v35, %s3742_s18  ;;  %v1155_v34 = vld [vmem:[%s4845_s7 + $0x28] sm:$0xff]  ;;  %v2212_v26 = vld [vmem:[%s4845_s7 + $0x110] sm:$0xff]  ;;  %v2213_v27 = vld [vmem:[%s4845_s7 + $0x118] sm:$0xff] }
 0x20c   :  { %811 = vst [vmem:[#allocation4 + $0x1f] sm:$0x1] %v806_v36  ;;  %v3492_v36 = vpack.c.bf16 %v1155_v34, %v1154_v33  ;;  %v2214_v33 = vld [vmem:[%s4845_s7 + $0x120] sm:$0xff]  ;;  %v2215_v34 = vld [vmem:[%s4845_s7 + $0x128] sm:$0xff] }
 0x20f   :  { %v821_v37 = vld [vmem:[#allocation4 + $0x10] ss:$2 sm:$0xff] }
 0x213   :  { %v823_v38 = vld [vmem:[#allocation4 + $0x11] ss:$2 sm:$0xff] }
 0x214   :  { %v824_v39 = vmax.f32 %v821_v37, %v823_v38  ;;  %v1156_v37 = vld [vmem:[%s4845_s7 + $0x30] sm:$0xff]  ;;  %v1157_v38 = vld [vmem:[%s4845_s7 + $0x38] sm:$0xff] }
 0x215   :  { %v3495_v40 = vpack.c.bf16 %v1157_v38, %v1156_v37  ;;  %v3516_v37 = vpack.c.bf16 %v2215_v34, %v2214_v33 }
 0x216   :  { %825 = vrot.lane.b32.xlu0 %v824_v39, %s3742_s18 }
 0x27c   :  { %v817_v42 = vpop.permute.xlu0 %816 }
 0x27d   :  { %v818_v44 = vmax.f32 %v815_v35, %v817_v42  ;;  %v3474_v35 = vpack.c.bf16 %v2203_v32, %v2202_v31 }
 0x27f   :  { %819 = vst [vmem:[#allocation5 + $0x1] sm:$0xff] %v818_v44  ;;  %2867 = vmatmul.mubr.f32.vlgmr.msra.gmra.mrb[30].mxu0 %v818_v44  ;;  %v2207_v44 = vld [vmem:[%s4845_s7 + $0xe8] sm:$0xff] }
 0x280   :  { %3439 = vmatpush3.bf16.msra.mxu0 %v3438_v43  ;;  %2869 = vmatprep.mubr.msk.f32.mxu0 %vm3741_vm1, %v3740_v4  ;;  %v2206_v43 = vld [vmem:[%s4845_s7 + $0xe0] sm:$0xff] }
 0x281   :  { %3440 = vmatprep.subr.bf16.mxu0 %v3739_v0 }
 0x284   :  { %3442 = vmatpush3.bf16.msra.mxu0 %v3441_v47  ;;  %v3480_v47 = vpack.c.bf16 %v2207_v44, %v2206_v43  ;;  %v2218_v43 = vld [vmem:[%s4845_s7 + $0x140] sm:$0xff] }
 0x285   :  { %3443 = vmatprep.subr.bf16.mxu0 %v3739_v0 }
 0x286   :  { %v829_v53 = vld [vmem:[#allocation5] sm:$0xff] }
 0x287   :  { %2908 = vmatmul.mubr.f32.vlgmr.msra.gmra.mrb[30].mxu1 %v829_v53  ;;  %v1028_v11 = vld [vmem:[#allocation5 + $0x2] sm:$0xff] }
 0x288   :  { %v826_v54 = vpop.permute.xlu0 %825  ;;  %3445 = vmatpush3.bf16.msra.mxu0 %v3444_v50  ;;  %2910 = vmatprep.mubr.msk.f32.mxu1 %vm3741_vm1, %v3740_v4  ;;  %v2209_v50 = vld [vmem:[%s4845_s7 + $0xf8] sm:$0xff] }
 0x289   :  { %v827_v56 = vmax.f32 %v824_v39, %v826_v54  ;;  %3446 = vmatprep.subr.bf16.mxu0 %v3739_v0  ;;  %3463 = vmatpush3.bf16.msra.mxu1 %v3462_v15  ;;  %v2204_v39 = vld [vmem:[%s4845_s7 + $0xd0] sm:$0xff]  ;;  %v3483_v53 = vpack.c.bf16 %v2209_v50, %v2208_v49  ;;  %v3501_v54 = vpack.c.bf16 %v1161_v52, %v1160_v51  ;;  %v2193_v15 = vld [vmem:[%s4846_s6] ss:$0 sm:$0xff]  ;;  %v2221_v51 = vld [vmem:[%s4845_s7 + $0x158] sm:$0xff] }
 0x28a   :  { %3464 = vmatprep.subr.bf16.mxu1 %v3739_v0  ;;  %v3477_v42 = vpack.c.bf16 %v2205_v41, %v2204_v39  ;;  %v2217_v41 = vld [vmem:[%s4845_s7 + $0x138] sm:$0xff] }
 0x28b   :  { %828 = vst [vmem:[#allocation5 + $0xa] sm:$0xff] %v827_v56 }
 0x28c   :  { %3448 = vmatpush3.bf16.msra.mxu0 %v3447_v55  ;;  %v1162_v55 = vld [vmem:[%s4845_s7 + $0x60] sm:$0xff] }
 0x28d   :  { %3449 = vmatprep.subr.bf16.mxu0 %v3739_v0  ;;  %3466 = vmatpush3.bf16.msra.mxu1 %v3465_v18  ;;  %v2210_v18 = vld [vmem:[%s4845_s7 + $0x100] sm:$0xff] }
 0x28e   :  { %3467 = vmatprep.subr.bf16.mxu1 %v3739_v0  ;;  %v3510_v22 = vpack.c.bf16 %v2211_v19, %v2210_v18 }
 0x290   :  { %3451 = vmatpush3.bf16.msra.mxu0 %v3450_v59  ;;  %v1165_v59 = vld [vmem:[%s4845_s7 + $0x78] sm:$0xff] }
 0x291   :  { %3452 = vmatprep.subr.bf16.mxu0 %v3739_v0  ;;  %3469 = vmatpush3.bf16.msra.mxu1 %v3468_v23  ;;  %v3507_v60 = vpack.c.bf16 %v1165_v59, %v1164_v58 }
 0x292   :  { %v849_v1 = vld [vmem:[#allocation5 + $0x9] sm:$0xff]  ;;  %v850_v7 = vld [vmem:[#allocation5 + $0x11] sm:$0x1]  ;;  %3470 = vmatprep.subr.bf16.mxu1 %v3739_v0 }
 0x293   :  { %v830_v2 = vld [vmem:[#allocation5 + $0x8] sm:$0xff]  ;;  %2870 = vmatmul.mubr.f32.gmra.mrb[32].mxu0 %v849_v1  ;;  %v831_v8 = vld [vmem:[#allocation5 + $0x10] sm:$0x1] }
 0x294   :  { %2911 = vmatmul.mubr.f32.gmra.mrb[32].mxu1 %v830_v2  ;;  %2872 = vmatprep.mubr.msk.f32.mxu0 %vm3741_vm1, %v3740_v4 }
 0x295   :  { %2913 = vmatprep.mubr.msk.f32.mxu1 %vm3741_vm1, %v3740_v4  ;;  %3454 = vmatpush3.bf16.msra.mxu0 %v3453_v62 }
 0x296   :  { %3455 = vmatprep.subr.bf16.mxu0 %v3739_v0  ;;  %3472 = vmatpush3.bf16.msra.mxu1 %v3471_v29 }
 0x297   :  { %2873 = vmatmul.mubr.f32.gmra.mrb[34].mxu0 %v850_v7  ;;  %3473 = vmatprep.subr.bf16.mxu1 %v3739_v0 }
 0x298   :  { %2914 = vmatmul.mubr.f32.gmra.mrb[34].mxu1 %v831_v8  ;;  %2948 = vmatprep.mubr.msk.f32.mxu0 %vm3741_vm1, %v3740_v4 }
 0x299   :  { %2989 = vmatprep.mubr.msk.f32.mxu1 %vm3741_vm1, %v3740_v4  ;;  %3457 = vmatpush3.bf16.msra.mxu0 %v3456_v5 }
 0x29a   :  { %3458 = vmatprep.subr.bf16.mxu0 %v3739_v0  ;;  %3475 = vmatpush3.bf16.msra.mxu1 %v3474_v35 }
 0x29b   :  { %3476 = vmatprep.subr.bf16.mxu1 %v3739_v0 }
 0x29d   :  { %3460 = vmatpush3.bf16.msra.mxu0 %v3459_v10 }
 0x29e   :  { %3485 = vmatprep.subr.bf16.mxu0 %v3739_v0  ;;  %3478 = vmatpush3.bf16.msra.mxu1 %v3477_v42 }
 0x29f   :  { %3479 = vmatprep.subr.bf16.mxu1 %v3739_v0 }
 0x2a0   :  { %2949 = vmatmul.mubr.f32.vlgmr.msra.gmra.mrb[36].mxu0 %v1028_v11 }
 0x2a1   :  { %2951 = vmatprep.mubr.msk.f32.mxu0 %vm3741_vm1, %v3740_v4  ;;  %3487 = vmatpush3.bf16.msra.mxu0 %v3486_v24 }
 0x2a2   :  { %3488 = vmatprep.subr.bf16.mxu0 %v3739_v0  ;;  %3481 = vmatpush3.bf16.msra.mxu1 %v3480_v47  ;;  %v3522_v47 = vpack.c.bf16 %v2219_v46, %v2218_v43  ;;  %v2239_v46 = vld [vmem:[%s4847_s9 + $0xe0] sm:$0xff] }
 0x2a3   :  { %3482 = vmatprep.subr.bf16.mxu1 %v3739_v0 }
 0x2a4   :  { %2952 = vmatmul.mubr.f32.gmra.mrb[38].mxu0 %v827_v56  ;;  %v1163_v56 = vld [vmem:[%s4845_s7 + $0x68] sm:$0xff] }
 0x2a5   :  { %2954 = vmatprep.mubr.msk.f32.mxu0 %vm3741_vm1, %v3740_v4  ;;  %3490 = vmatpush3.bf16.msra.mxu0 %v3489_v30  ;;  %v3504_v57 = vpack.c.bf16 %v1163_v56, %v1162_v55  ;;  %v3513_v30 = vpack.c.bf16 %v2213_v27, %v2212_v26  ;;  %v2224_v56 = vld [vmem:[%s4845_s7 + $0x170] sm:$0xff]  ;;  %v2226_v26 = vld [vmem:[%s4848_s8] ss:$0 sm:$0xff] }
 0x2a6   :  { %3491 = vmatprep.subr.bf16.mxu0 %v3739_v0  ;;  %3484 = vmatpush3.bf16.msra.mxu1 %v3483_v53  ;;  %v2222_v53 = vld [vmem:[%s4845_s7 + $0x160] sm:$0xff] }
 0x2a7   :  { %3509 = vmatprep.subr.bf16.mxu1 %v3739_v0 }
 0x2a8   :  { %2955 = vmatmul.mubr.f32.gmra.mrb[40].mxu0 %v1030_v12 }
 0x2a9   :  { %3030 = vmatprep.mubr.msk.f32.mxu0 %vm3741_vm1, %v3740_v4  ;;  %3493 = vmatpush3.bf16.msra.mxu0 %v3492_v36 }
 0x2aa   :  { %3494 = vmatprep.subr.bf16.mxu0 %v3739_v0 }
 0x2ad   :  { %3496 = vmatpush3.bf16.msra.mxu0 %v3495_v40  ;;  %v2216_v40 = vld [vmem:[%s4845_s7 + $0x130] sm:$0xff] }
 0x2ae   :  { %3497 = vmatprep.subr.bf16.mxu0 %v3739_v0  ;;  %v3519_v42 = vpack.c.bf16 %v2217_v41, %v2216_v40 }
 0x2b1   :  { %3499 = vmatpush3.bf16.msra.mxu0 %v3498_v48  ;;  %v2220_v48 = vld [vmem:[%s4845_s7 + $0x150] sm:$0xff] }
 0x2b2   :  { %3500 = vmatprep.subr.bf16.mxu0 %v3739_v0  ;;  %v3525_v52 = vpack.c.bf16 %v2221_v51, %v2220_v48 }
 0x2b5   :  { %3502 = vmatpush3.bf16.msra.mxu0 %v3501_v54  ;;  %v2223_v54 = vld [vmem:[%s4845_s7 + $0x168] sm:$0xff] }
 0x2b6   :  { %3503 = vmatprep.subr.bf16.mxu0 %v3739_v0  ;;  %v3528_v55 = vpack.c.bf16 %v2223_v54, %v2222_v53  ;;  %v2241_v53 = vld [vmem:[%s4847_s9 + $0xf0] sm:$0xff]  ;;  %v2242_v54 = vld [vmem:[%s4847_s9 + $0xf8] sm:$0xff] }
 0x2b9   :  { %3505 = vmatpush3.bf16.msra.mxu0 %v3504_v57  ;;  %v2225_v57 = vld [vmem:[%s4845_s7 + $0x178] sm:$0xff] }
 0x2ba   :  { %3506 = vmatprep.subr.bf16.mxu0 %v3739_v0  ;;  %v3531_v58 = vpack.c.bf16 %v2225_v57, %v2224_v56  ;;  %v1484_v56 = vld [vmem:[%s4847_s9] sm:$0xff]  ;;  %v1485_v57 = vld [vmem:[%s4847_s9 + $0x8] sm:$0xff] }
 0x2bd   :  { %3508 = vmatpush3.bf16.msra.mxu0 %v3507_v60 }
 0x352   :  { %v934_v61 = vpop.f32.mrb[30].mxu0 }
 0x353   :  { %v2868_v62 = vpop.f32.mrb[31].mxu0 }
 0x354   :  { %v2227_v62 = vld [vmem:[%s4847_s9 + $0x80] sm:$0xff] }
 0x35a   :  { %v1014_v63 = vpop.f32.mrb[30].mxu1 }
 0x35b   :  { %v1015_v1 = vadd.f32 %v1014_v63, %v934_v61  ;;  %v2909_v2 = vpop.f32.mrb[31].mxu1  ;;  %v1348_v61 = vld [vmem:[#allocation6 + $0x12] sm:$0x1]  ;;  %v2229_v63 = vld [vmem:[%s4847_s9 + $0x90] sm:$0xff] }
 0x35c   :  { %v2230_v2 = vld [vmem:[%s4847_s9 + $0x98] sm:$0xff] }
 0x366   :  { %v939_v3 = vpop.f32.mrb[32].mxu0 }
 0x367   :  { %v1019_v5 = vpop.f32.mrb[32].mxu1  ;;  %v2871_v7 = vpop.f32.mrb[33].mxu0 }
 0x368   :  { %v1020_v6 = vadd.f32 %v1019_v5, %v939_v3  ;;  %v2912_v8 = vpop.f32.mrb[33].mxu1  ;;  %v2231_v3 = vld [vmem:[%s4847_s9 + $0xa0] sm:$0xff]  ;;  %v2232_v5 = vld [vmem:[%s4847_s9 + $0xa8] sm:$0xff]  ;;  %v2233_v7 = vld [vmem:[%s4847_s9 + $0xb0] sm:$0xff] }
 0x369   :  { %v2234_v8 = vld [vmem:[%s4847_s9 + $0xb8] sm:$0xff] }
 0x36a   :  { %v944_v9 = vpop.f32.mrb[34].mxu0 }
 0x36b   :  { %v1024_v10 = vpop.f32.mrb[34].mxu1  ;;  %v2874_v12 = vpop.f32.mrb[35].mxu0 }
 0x36c   :  { %v1025_v11 = vadd.f32 %v1024_v10, %v944_v9  ;;  %v2915_v13 = vpop.f32.mrb[35].mxu1  ;;  %v3545_v9 = vpack.c.bf16 %v2234_v8, %v2233_v7  ;;  %v2266_v7 = vld [vmem:[%s4849_s11 + $0xb0] sm:$0xff]  ;;  %v2267_v8 = vld [vmem:[%s4849_s11 + $0xb8] sm:$0xff] }
 0x373   :  { %v1114_v14 = vpop.f32.mrb[36].mxu0 }
 0x374   :  { %v1128_v16 = vadd.f32 %v1114_v14, %v1015_v1  ;;  %v2950_v17 = vpop.f32.mrb[37].mxu0 }
 0x376   :  { %v1138_v20 = vadd.f32 %v2193_v15, %v1128_v16 }
 0x377   :  { %v1119_v21 = vpop.f32.mrb[38].mxu0 }
 0x378   :  { %v1141_v23 = vmax.f32 %v1138_v20, 0.0  ;;  %v1129_v24 = vadd.f32 %v1119_v21, %v1020_v6  ;;  %v2953_v25 = vpop.f32.mrb[39].mxu0  ;;  %v3541_v6 = vpack.c.bf16 %v2232_v5, %v2231_v3  ;;  %v2264_v3 = vld [vmem:[%s4849_s11 + $0xa0] sm:$0xff]  ;;  %v2265_v5 = vld [vmem:[%s4849_s11 + $0xa8] sm:$0xff] }
 0x37a   :  { %1144 = vst [vmem:[#allocation6 + $0x1] sm:$0xff] %v1141_v23  ;;  %v1139_v28 = vadd.f32 %v2193_v15, %v1129_v24  ;;  %2990 = vmatmul.mubr.f32.vlgmr.msra.gmra.mrb[36].mxu1 %v1141_v23 }
 0x37b   :  { %v1124_v29 = vpop.f32.mrb[40].mxu0  ;;  %3511 = vmatpush3.bf16.msra.mxu1 %v3510_v22  ;;  %2992 = vmatprep.mubr.msk.f32.mxu1 %vm3741_vm1, %v3740_v4 }
 0x37c   :  { %v1142_v31 = vmax.f32 %v1139_v28, 0.0  ;;  %v1130_v32 = vadd.f32 %v1124_v29, %v1025_v11  ;;  %3512 = vmatprep.subr.bf16.mxu1 %v3739_v0  ;;  %v2956_v35 = vpop.f32.mrb[41].mxu0 }
 0x37e   :  { %1145 = vst [vmem:[#allocation6 + $0x9] sm:$0xfe] %v1142_v31  ;;  %v1140_v36 = vadd.f32 %v2193_v15, %v1130_v32  ;;  %v2236_v31 = vld [vmem:[%s4847_s9 + $0xc8] sm:$0xff] }
 0x37f   :  { %3514 = vmatpush3.bf16.msra.mxu1 %v3513_v30  ;;  %v2235_v30 = vld [vmem:[%s4847_s9 + $0xc0] sm:$0xff] }
 0x380   :  { %v1143_v38 = vmax.f32 %v1140_v36, 0.0  ;;  %3515 = vmatprep.subr.bf16.mxu1 %v3739_v0  ;;  %v3549_v33 = vpack.c.bf16 %v2236_v31, %v2235_v30  ;;  %v1493_v30 = vld [vmem:[%s4847_s9 + $0x48] sm:$0xff] }
 0x381   :  { %v1147_v39 = vld [vmem:[#allocation6] sm:$0xff] }
 0x382   :  { %1146 = vst [vmem:[#allocation6 + $0x11] sm:$0x1] %v1143_v38  ;;  %3031 = vmatmul.mubr.f32.vlgmr.msra.gmra.mrb[42].mxu0 %v1147_v39  ;;  %v1346_v59 = vld [vmem:[#allocation6 + $0x2] sm:$0xff]  ;;  %v2238_v38 = vld [vmem:[%s4847_s9 + $0xd8] sm:$0xff] }
 0x383   :  { %3033 = vmatprep.mubr.msk.f32.mxu0 %vm3741_vm1, %v3740_v4  ;;  %3517 = vmatpush3.bf16.msra.mxu1 %v3516_v37  ;;  %v2237_v37 = vld [vmem:[%s4847_s9 + $0xd0] sm:$0xff] }
 0x384   :  { %3518 = vmatprep.subr.bf16.mxu1 %v3739_v0  ;;  %v3553_v40 = vpack.c.bf16 %v2238_v38, %v2237_v37  ;;  %v1498_v38 = vld [vmem:[%s4847_s9 + $0x70] sm:$0xff] }
 0x385   :  { %v1167_v44 = vld [vmem:[#allocation6 + $0x9] sm:$0xff] }
 0x386   :  { %v1148_v45 = vld [vmem:[#allocation6 + $0x8] sm:$0xff]  ;;  %2993 = vmatmul.mubr.f32.gmra.mrb[38].mxu1 %v1167_v44  ;;  %v1149_v50 = vld [vmem:[#allocation6 + $0x10] sm:$0x1] }
 0x387   :  { %3034 = vmatmul.mubr.f32.gmra.mrb[44].mxu0 %v1148_v45  ;;  %2995 = vmatprep.mubr.msk.f32.mxu1 %vm3741_vm1, %v3740_v4 }
 0x388   :  { %3036 = vmatprep.mubr.msk.f32.mxu0 %vm3741_vm1, %v3740_v4  ;;  %3520 = vmatpush3.bf16.msra.mxu1 %v3519_v42 }
 0x389   :  { %v1168_v49 = vld [vmem:[#allocation6 + $0x11] sm:$0x1]  ;;  %3521 = vmatprep.subr.bf16.mxu1 %v3739_v0 }
 0x38a   :  { %2996 = vmatmul.mubr.f32.gmra.mrb[40].mxu1 %v1168_v49  ;;  %v1347_v60 = vld [vmem:[#allocation6 + $0xa] sm:$0xff] }
 0x38b   :  { %3037 = vmatmul.mubr.f32.gmra.mrb[46].mxu0 %v1149_v50  ;;  %3071 = vmatprep.mubr.msk.f32.mxu1 %vm3741_vm1, %v3740_v4 }
 0x38c   :  { %3523 = vmatpush3.bf16.msra.mxu1 %v3522_v47  ;;  %v2240_v47 = vld [vmem:[%s4847_s9 + $0xe8] sm:$0xff] }
 0x38d   :  { %3524 = vmatprep.subr.bf16.mxu1 %v3739_v0  ;;  %v3557_v48 = vpack.c.bf16 %v2240_v47, %v2239_v46 }
 0x390   :  { %3526 = vmatpush3.bf16.msra.mxu1 %v3525_v52 }
 0x391   :  { %3527 = vmatprep.subr.bf16.mxu1 %v3739_v0 }
 0x394   :  { %3529 = vmatpush3.bf16.msra.mxu1 %v3528_v55  ;;  %v3561_v55 = vpack.c.bf16 %v2242_v54, %v2241_v53  ;;  %v2250_v53 = vld [vmem:[%s4847_s9 + $0x138] sm:$0xff] }
 0x395   :  { %3530 = vmatprep.subr.bf16.mxu1 %v3739_v0  ;;  %v2228_v0 = vld [vmem:[%s4847_s9 + $0x88] sm:$0xff] }
 0x396   :  { %v3533_v1 = vpack.c.bf16 %v2228_v0, %v2227_v62  ;;  %v2260_v62 = vld [vmem:[%s4849_s11 + $0x80] sm:$0xff]  ;;  %v2261_v0 = vld [vmem:[%s4849_s11 + $0x88] sm:$0xff] }
 0x398   :  { %3532 = vmatpush3.bf16.msra.mxu1 %v3531_v58  ;;  %3534 = vmatprep.subr.bf16.mxu0 %v3533_v1  ;;  %v3565_v58 = vpack.c.bf16 %v1485_v57, %v1484_v56  ;;  %v2252_v56 = vld [vmem:[%s4847_s9 + $0x148] sm:$0xff] }
 0x399   :  { %3536 = vmatpush3.bf16.msra.mxu0 %v3533_v1  ;;  %v3629_v1 = vpack.c.bf16 %v2261_v0, %v2260_v62  ;;  %v2256_v62 = vld [vmem:[%s4847_s9 + $0x168] sm:$0xff] }
 0x39b   :  { %3072 = vmatmul.mubr.f32.vlgmr.msra.gmra.mrb[42].mxu1 %v1346_v59  ;;  %3630 = vmatprep.subr.bf16.mxu1 %v3629_v1 }
 0x39c   :  { %3074 = vmatprep.mubr.msk.f32.mxu1 %vm3741_vm1, %v3740_v4  ;;  %3632 = vmatpush3.bf16.msra.mxu1 %v3629_v1  ;;  %v2258_v1 = vld [vmem:[%s4847_s9 + $0x178] sm:$0xff] }
 0x39f   :  { %3075 = vmatmul.mubr.f32.gmra.mrb[44].mxu1 %v1347_v60 }
 0x3a0   :  { %3077 = vmatprep.mubr.msk.f32.mxu1 %vm3741_vm1, %v3740_v4  ;;  %v3537_v4 = vpack.c.bf16 %v2230_v2, %v2229_v63  ;;  %v2262_v63 = vld [vmem:[%s4849_s11 + $0x90] sm:$0xff]  ;;  %v2263_v2 = vld [vmem:[%s4849_s11 + $0x98] sm:$0xff] }
 0x3a2   :  { %3538 = vmatprep.subr.bf16.mxu0 %v3537_v4 }
 0x3a3   :  { %3078 = vmatmul.mubr.f32.gmra.mrb[46].mxu1 %v1348_v61  ;;  %3540 = vmatpush3.bf16.msra.mxu0 %v3537_v4  ;;  %v3633_v4 = vpack.c.bf16 %v2263_v2, %v2262_v63  ;;  %v2257_v63 = vld [vmem:[%s4847_s9 + $0x170] sm:$0xff] }
 0x3a4   :  { %3542 = vmatprep.subr.bf16.mxu0 %v3541_v6  ;;  %v3625_v2 = vpack.c.bf16 %v2258_v1, %v2257_v63  ;;  %v2286_v63 = vld [vmem:[%s4849_s11 + $0x150] sm:$0xff]  ;;  %v2287_v1 = vld [vmem:[%s4849_s11 + $0x158] sm:$0xff] }
 0x3a5   :  { %3634 = vmatprep.subr.bf16.mxu1 %v3633_v4 }
 0x3a6   :  { %3636 = vmatpush3.bf16.msra.mxu1 %v3633_v4  ;;  %v1670_v4 = vld [vmem:[#allocation8 + $0xa] sm:$0x1] }
 0x3a7   :  { %3544 = vmatpush3.bf16.msra.mxu0 %v3541_v6  ;;  %v3637_v6 = vpack.c.bf16 %v2265_v5, %v2264_v3  ;;  %v2270_v3 = vld [vmem:[%s4849_s11 + $0xd0] sm:$0xff]  ;;  %v2271_v5 = vld [vmem:[%s4849_s11 + $0xd8] sm:$0xff] }
 0x3a8   :  { %3546 = vmatprep.subr.bf16.mxu0 %v3545_v9 }
 0x3a9   :  { %3638 = vmatprep.subr.bf16.mxu1 %v3637_v6 }
 0x3aa   :  { %3640 = vmatpush3.bf16.msra.mxu1 %v3637_v6  ;;  %v3649_v6 = vpack.c.bf16 %v2271_v5, %v2270_v3  ;;  %v2289_v3 = vld [vmem:[%s4849_s11 + $0x168] sm:$0xff] }
 0x3ab   :  { %3548 = vmatpush3.bf16.msra.mxu0 %v3545_v9  ;;  %v3641_v9 = vpack.c.bf16 %v2267_v8, %v2266_v7  ;;  %v2272_v7 = vld [vmem:[%s4849_s11 + $0xe0] sm:$0xff]  ;;  %v2273_v8 = vld [vmem:[%s4849_s11 + $0xe8] sm:$0xff] }
 0x3ac   :  { %3550 = vmatprep.subr.bf16.mxu0 %v3549_v33 }
 0x3ad   :  { %3642 = vmatprep.subr.bf16.mxu1 %v3641_v9 }
 0x3ae   :  { %3644 = vmatpush3.bf16.msra.mxu1 %v3641_v9  ;;  %v3653_v9 = vpack.c.bf16 %v2273_v8, %v2272_v7  ;;  %v2291_v7 = vld [vmem:[%s4849_s11 + $0x178] sm:$0xff] }
 0x3af   :  { %3552 = vmatpush3.bf16.msra.mxu0 %v3549_v33  ;;  %v1495_v33 = vld [vmem:[%s4847_s9 + $0x58] sm:$0xff] }
 0x3b0   :  { %3554 = vmatprep.subr.bf16.mxu0 %v3553_v40 }
 0x3b3   :  { %3556 = vmatpush3.bf16.msra.mxu0 %v3553_v40 }
 0x3b4   :  { %3558 = vmatprep.subr.bf16.mxu0 %v3557_v48 }
 0x3b7   :  { %3560 = vmatpush3.bf16.msra.mxu0 %v3557_v48  ;;  %v2247_v48 = vld [vmem:[%s4847_s9 + $0x120] sm:$0xff] }
 0x3b8   :  { %3562 = vmatprep.subr.bf16.mxu0 %v3561_v55 }
 0x3bb   :  { %3564 = vmatpush3.bf16.msra.mxu0 %v3561_v55  ;;  %v2251_v55 = vld [vmem:[%s4847_s9 + $0x140] sm:$0xff] }
 0x3bc   :  { %3566 = vmatprep.subr.bf16.mxu0 %v3565_v58  ;;  %v3613_v57 = vpack.c.bf16 %v2252_v56, %v2251_v55  ;;  %v2281_v55 = vld [vmem:[%s4849_s11 + $0x128] sm:$0xff] }
 0x44d   :  { %v1252_v10 = vpop.f32.mrb[36].mxu1 }
 0x44e   :  { %v2991_v11 = vpop.f32.mrb[37].mxu1 }
 0x44f   :  { %v2269_v11 = vld [vmem:[%s4849_s11 + $0xc8] sm:$0xff] }
 0x455   :  { %v1332_v12 = vpop.f32.mrb[42].mxu0 }
 0x456   :  { %v1333_v13 = vadd.f32 %v1332_v12, %v1252_v10  ;;  %v3032_v14 = vpop.f32.mrb[43].mxu0  ;;  %v2268_v10 = vld [vmem:[%s4849_s11 + $0xc0] sm:$0xff] }
 0x457   :  { %v3645_v12 = vpack.c.bf16 %v2269_v11, %v2268_v10  ;;  %v2274_v10 = vld [vmem:[%s4849_s11 + $0xf0] sm:$0xff]  ;;  %v2275_v11 = vld [vmem:[%s4849_s11 + $0xf8] sm:$0xff] }
 0x459   :  { %v1257_v15 = vpop.f32.mrb[38].mxu1  ;;  %3646 = vmatprep.subr.bf16.mxu1 %v3645_v12 }
 0x45a   :  { %v1337_v16 = vpop.f32.mrb[44].mxu0  ;;  %v2994_v18 = vpop.f32.mrb[39].mxu1  ;;  %3648 = vmatpush3.bf16.msra.mxu1 %v3645_v12  ;;  %v3657_v12 = vpack.c.bf16 %v2275_v11, %v2274_v10  ;;  %v2292_v10 = vld [vmem:[%s4851_s12] ss:$0 sm:$0xff] }
 0x45b   :  { %v1338_v17 = vadd.f32 %v1337_v16, %v1257_v15  ;;  %v3035_v19 = vpop.f32.mrb[45].mxu0  ;;  %v1487_v18 = vld [vmem:[%s4847_s9 + $0x18] sm:$0xff]  ;;  %3650 = vmatprep.subr.bf16.mxu1 %v3649_v6 }
 0x45d   :  { %v1262_v20 = vpop.f32.mrb[40].mxu1 }
 0x45e   :  { %v1342_v21 = vpop.f32.mrb[46].mxu0  ;;  %v2997_v23 = vpop.f32.mrb[41].mxu1  ;;  %3652 = vmatpush3.bf16.msra.mxu1 %v3649_v6  ;;  %v2290_v6 = vld [vmem:[%s4849_s11 + $0x170] sm:$0xff] }
 0x45f   :  { %v1343_v22 = vadd.f32 %v1342_v21, %v1262_v20  ;;  %v3038_v24 = vpop.f32.mrb[47].mxu0  ;;  %v1489_v23 = vld [vmem:[%s4847_s9 + $0x28] sm:$0xff]  ;;  %3654 = vmatprep.subr.bf16.mxu1 %v3653_v9  ;;  %v3721_v8 = vpack.c.bf16 %v2291_v7, %v2290_v6 }
 0x462   :  { %3656 = vmatpush3.bf16.msra.mxu1 %v3653_v9  ;;  %v1967_v9 = vld [vmem:[#allocation9 + $0xa] sm:$0x1] }
 0x463   :  { %3658 = vmatprep.subr.bf16.mxu1 %v3657_v12 }
 0x466   :  { %3660 = vmatpush3.bf16.msra.mxu1 %v3657_v12 }
 0x46e   :  { %v1432_v25 = vpop.f32.mrb[42].mxu1 }
 0x46f   :  { %v1446_v27 = vadd.f32 %v1432_v25, %v1333_v13  ;;  %v3073_v28 = vpop.f32.mrb[43].mxu1 }
 0x471   :  { %v1456_v29 = vadd.f32 %v2226_v26, %v1446_v27  ;;  %v1491_v27 = vld [vmem:[%s4847_s9 + $0x38] sm:$0xff] }
 0x472   :  { %v1437_v32 = vpop.f32.mrb[44].mxu1 }
 0x473   :  { %v1459_v34 = vmax.f32 %v1456_v29, 0.0  ;;  %v1447_v35 = vadd.f32 %v1437_v32, %v1338_v17  ;;  %v3076_v36 = vpop.f32.mrb[45].mxu1  ;;  %v1486_v17 = vld [vmem:[%s4847_s9 + $0x10] sm:$0xff]  ;;  %v1492_v29 = vld [vmem:[%s4847_s9 + $0x40] sm:$0xff] }
 0x474   :  { %v3569_v21 = vpack.c.bf16 %v1487_v18, %v1486_v17  ;;  %v3581_v31 = vpack.c.bf16 %v1493_v30, %v1492_v29  ;;  %v1494_v32 = vld [vmem:[%s4847_s9 + $0x50] sm:$0xff]  ;;  %v1497_v36 = vld [vmem:[%s4847_s9 + $0x68] sm:$0xff] }
 0x475   :  { %1462 = vst [vmem:[#allocation7] sm:$0xff] %v1459_v34  ;;  %v1457_v39 = vadd.f32 %v2226_v26, %v1447_v35  ;;  %v3585_v34 = vpack.c.bf16 %v1495_v33, %v1494_v32  ;;  %v1496_v35 = vld [vmem:[%s4847_s9 + $0x60] sm:$0xff]  ;;  %v1786_v29 = vld [vmem:[%s4849_s11 + $0x28] sm:$0xff]  ;;  %v1787_v32 = vld [vmem:[%s4849_s11 + $0x30] sm:$0xff] }
 0x476   :  { %v1442_v41 = vpop.f32.mrb[46].mxu1  ;;  %v3589_v37 = vpack.c.bf16 %v1497_v36, %v1496_v35  ;;  %v1788_v33 = vld [vmem:[%s4849_s11 + $0x38] sm:$0xff]  ;;  %v1789_v35 = vld [vmem:[%s4849_s11 + $0x40] sm:$0xff]  ;;  %v1790_v36 = vld [vmem:[%s4849_s11 + $0x48] sm:$0xff] }
 0x477   :  { %v1460_v42 = vmax.f32 %v1457_v39, 0.0  ;;  %v1448_v43 = vadd.f32 %v1442_v41, %v1343_v22  ;;  %v3079_v44 = vpop.f32.mrb[47].mxu1  ;;  %v1488_v22 = vld [vmem:[%s4847_s9 + $0x20] sm:$0xff]  ;;  %v1499_v39 = vld [vmem:[%s4847_s9 + $0x78] sm:$0xff] }
 0x478   :  { %v3573_v25 = vpack.c.bf16 %v1489_v23, %v1488_v22  ;;  %v3593_v40 = vpack.c.bf16 %v1499_v39, %v1498_v38  ;;  %v2243_v41 = vld [vmem:[%s4847_s9 + $0x100] sm:$0xff]  ;;  %v2245_v44 = vld [vmem:[%s4847_s9 + $0x110] sm:$0xff]  ;;  %v1792_v39 = vld [vmem:[%s4849_s11 + $0x58] sm:$0xff] }
 0x479   :  { %1463 = vst [vmem:[#allocation7 + $0x7] sm:$0xfe] %v1460_v42  ;;  %v1458_v45 = vadd.f32 %v2226_v26, %v1448_v43  ;;  %v1490_v26 = vld [vmem:[%s4847_s9 + $0x30] sm:$0xff]  ;;  %v2244_v42 = vld [vmem:[%s4847_s9 + $0x108] sm:$0xff] }
 0x47a   :  { %v3577_v28 = vpack.c.bf16 %v1491_v27, %v1490_v26  ;;  %v3597_v43 = vpack.c.bf16 %v2244_v42, %v2243_v41  ;;  %v1783_v23 = vld [vmem:[%s4849_s11 + $0x10] sm:$0xff]  ;;  %v1793_v41 = vld [vmem:[%s4849_s11 + $0x60] sm:$0xff]  ;;  %v1794_v42 = vld [vmem:[%s4849_s11 + $0x68] sm:$0xff] }
 0x47b   :  { %v1461_v49 = vmax.f32 %v1458_v45, 0.0  ;;  %v2246_v45 = vld [vmem:[%s4847_s9 + $0x118] sm:$0xff]  ;;  %v1791_v38 = vld [vmem:[%s4849_s11 + $0x50] sm:$0xff] }
 0x47c   :  { %v1465_v50 = vld [vmem:[#allocation7] ss:$2 sm:$0xf]  ;;  %v1467_v51 = vld [vmem:[#allocation7 + $0x1] ss:$2 sm:$0xf]  ;;  %v3601_v46 = vpack.c.bf16 %v2246_v45, %v2245_v44 }
 0x47d   :  { %1464 = vst [vmem:[#allocation7 + $0xf] sm:$0x1] %v1461_v49  ;;  %v1468_v52 = vmax.f32 %v1465_v50, %v1467_v51  ;;  %v2248_v49 = vld [vmem:[%s4847_s9 + $0x128] sm:$0xff]  ;;  %v1795_v44 = vld [vmem:[%s4849_s11 + $0x70] sm:$0xff]  ;;  %v1796_v45 = vld [vmem:[%s4849_s11 + $0x78] sm:$0xff] }
 0x47e   :  { %v3605_v51 = vpack.c.bf16 %v2248_v49, %v2247_v48  ;;  %v2277_v48 = vld [vmem:[%s4849_s11 + $0x108] sm:$0xff] }
 0x47f   :  { %1469 = vrot.lane.b32.xlu1 %v1468_v52, %s3743_s17 }
 0x480   :  { %v1474_v59 = vld [vmem:[#allocation7 + $0x8] ss:$2 sm:$0xf] }
 0x484   :  { %v1476_v60 = vld [vmem:[#allocation7 + $0x9] ss:$2 sm:$0xf] }
 0x485   :  { %v1477_v61 = vmax.f32 %v1474_v59, %v1476_v60  ;;  %v2254_v59 = vld [vmem:[%s4847_s9 + $0x158] sm:$0xff] }
 0x487   :  { %1478 = vrot.lane.b32.xlu1 %v1477_v61, %s3743_s17 }
 0x4f1   :  { %v1470_v13 = vpop.permute.xlu1 %1469 }
 0x4f2   :  { %v1471_v14 = vmax.f32 %v1468_v52, %v1470_v13  ;;  %v2249_v52 = vld [vmem:[%s4847_s9 + $0x130] sm:$0xff]  ;;  %v1781_v13 = vld [vmem:[%s4849_s11] sm:$0xff] }
 0x4f3   :  { %v3609_v54 = vpack.c.bf16 %v2250_v53, %v2249_v52 }
 0x4f4   :  { %1472 = vst [vmem:[#allocation8 + $0x1] sm:$0xf] %v1471_v14  ;;  %v1782_v14 = vld [vmem:[%s4849_s11 + $0x8] sm:$0xff] }
 0x4f9   :  { %v1479_v15 = vpop.permute.xlu1 %1478 }
 0x4fa   :  { %v1480_v16 = vmax.f32 %v1477_v61, %v1479_v15  ;;  %v2255_v61 = vld [vmem:[%s4847_s9 + $0x160] sm:$0xff]  ;;  %v3661_v15 = vpack.c.bf16 %v1782_v14, %v1781_v13 }
 0x4fb   :  { %v3621_v0 = vpack.c.bf16 %v2256_v62, %v2255_v61  ;;  %v2284_v61 = vld [vmem:[%s4849_s11 + $0x140] sm:$0xff]  ;;  %v2285_v62 = vld [vmem:[%s4849_s11 + $0x148] sm:$0xff] }
 0x4fc   :  { %1481 = vst [vmem:[#allocation8 + $0x6] sm:$0xf] %v1480_v16  ;;  %3662 = vmatprep.subr.bf16.mxu1 %v3661_v15  ;;  %v2259_v16 = vld [vmem:[%s4850_s10] ss:$0 sm:$0xff] }
 0x503   :  { %v1500_v19 = vld [vmem:[#allocation8 + $0x1] sm:$0xff]  ;;  %v1501_v20 = vld [vmem:[#allocation8 + $0x9] sm:$0x1] }
 0x504   :  { %3112 = vmatprep.mubr.f32.mxu0 %v1500_v19  ;;  %v1482_v24 = vld [vmem:[#allocation8] sm:$0xff]  ;;  %v1483_v47 = vld [vmem:[#allocation8 + $0x8] sm:$0x1] }
 0x505   :  { %3113 = vmatmul.mubr.f32.vlgmr.msra.gmra.mrb[48].mxu0 %v1501_v20  ;;  %v1669_v50 = vld [vmem:[#allocation8 + $0x2] sm:$0xff] }
 0x506   :  { %3568 = vmatpush3.bf16.msra.mxu0 %v3565_v58  ;;  %3147 = vmatprep.mubr.f32.mxu0 %v1482_v24  ;;  %v2253_v58 = vld [vmem:[%s4847_s9 + $0x150] sm:$0xff]  ;;  %v1784_v24 = vld [vmem:[%s4849_s11 + $0x18] sm:$0xff] }
 0x507   :  { %3570 = vmatprep.subr.bf16.mxu0 %v3569_v21  ;;  %v3617_v60 = vpack.c.bf16 %v2254_v59, %v2253_v58  ;;  %v3665_v26 = vpack.c.bf16 %v1784_v24, %v1783_v23  ;;  %v2282_v58 = vld [vmem:[%s4849_s11 + $0x130] sm:$0xff]  ;;  %v2283_v59 = vld [vmem:[%s4849_s11 + $0x138] sm:$0xff] }
 0x50a   :  { %3572 = vmatpush3.bf16.msra.mxu0 %v3569_v21 }
 0x50b   :  { %3574 = vmatprep.subr.bf16.mxu0 %v3573_v25 }
 0x50e   :  { %3576 = vmatpush3.bf16.msra.mxu0 %v3573_v25 }
 0x50f   :  { %3578 = vmatprep.subr.bf16.mxu0 %v3577_v28 }
 0x512   :  { %3580 = vmatpush3.bf16.msra.mxu0 %v3577_v28  ;;  %v1785_v28 = vld [vmem:[%s4849_s11 + $0x20] sm:$0xff] }
 0x513   :  { %3582 = vmatprep.subr.bf16.mxu0 %v3581_v31 }
 0x516   :  { %3584 = vmatpush3.bf16.msra.mxu0 %v3581_v31  ;;  %v3669_v31 = vpack.c.bf16 %v1786_v29, %v1785_v28 }
 0x517   :  { %3586 = vmatprep.subr.bf16.mxu0 %v3585_v34 }
 0x51a   :  { %3588 = vmatpush3.bf16.msra.mxu0 %v3585_v34  ;;  %v3673_v34 = vpack.c.bf16 %v1788_v33, %v1787_v32 }
 0x51b   :  { %3590 = vmatprep.subr.bf16.mxu0 %v3589_v37 }
 0x51e   :  { %3592 = vmatpush3.bf16.msra.mxu0 %v3589_v37  ;;  %v3677_v37 = vpack.c.bf16 %v1790_v36, %v1789_v35 }
 0x51f   :  { %3594 = vmatprep.subr.bf16.mxu0 %v3593_v40 }
 0x522   :  { %3596 = vmatpush3.bf16.msra.mxu0 %v3593_v40  ;;  %v3681_v40 = vpack.c.bf16 %v1792_v39, %v1791_v38 }
 0x523   :  { %3598 = vmatprep.subr.bf16.mxu0 %v3597_v43 }
 0x525   :  { %3148 = vmatmul.mubr.f32.vlgmr.msra.gmra.mrb[48].mxu0 %v1483_v47  ;;  %v2276_v47 = vld [vmem:[%s4849_s11 + $0x100] sm:$0xff] }
 0x526   :  { %3600 = vmatpush3.bf16.msra.mxu0 %v3597_v43  ;;  %3182 = vmatprep.mubr.f32.mxu0 %v1669_v50  ;;  %v3685_v43 = vpack.c.bf16 %v1794_v42, %v1793_v41  ;;  %v3693_v49 = vpack.c.bf16 %v2277_v48, %v2276_v47  ;;  %v2278_v50 = vld [vmem:[%s4849_s11 + $0x110] sm:$0xff] }
 0x527   :  { %3602 = vmatprep.subr.bf16.mxu0 %v3601_v46 }
 0x52a   :  { %3604 = vmatpush3.bf16.msra.mxu0 %v3601_v46  ;;  %v3689_v46 = vpack.c.bf16 %v1796_v45, %v1795_v44 }
 0x52b   :  { %3606 = vmatprep.subr.bf16.mxu0 %v3605_v51 }
 0x52e   :  { %3608 = vmatpush3.bf16.msra.mxu0 %v3605_v51  ;;  %v2279_v51 = vld [vmem:[%s4849_s11 + $0x118] sm:$0xff] }
 0x52f   :  { %3610 = vmatprep.subr.bf16.mxu0 %v3609_v54  ;;  %v3697_v52 = vpack.c.bf16 %v2279_v51, %v2278_v50 }
 0x532   :  { %3612 = vmatpush3.bf16.msra.mxu0 %v3609_v54  ;;  %v2280_v54 = vld [vmem:[%s4849_s11 + $0x120] sm:$0xff] }
 0x533   :  { %3614 = vmatprep.subr.bf16.mxu0 %v3613_v57 }
 0x536   :  { %3616 = vmatpush3.bf16.msra.mxu0 %v3613_v57  ;;  %v3701_v57 = vpack.c.bf16 %v2281_v55, %v2280_v54 }
 0x537   :  { %3618 = vmatprep.subr.bf16.mxu0 %v3617_v60 }
 0x53a   :  { %3620 = vmatpush3.bf16.msra.mxu0 %v3617_v60  ;;  %v3705_v60 = vpack.c.bf16 %v2283_v59, %v2282_v58 }
 0x53b   :  { %3622 = vmatprep.subr.bf16.mxu0 %v3621_v0 }
 0x53e   :  { %3624 = vmatpush3.bf16.msra.mxu0 %v3621_v0  ;;  %v3709_v0 = vpack.c.bf16 %v2285_v62, %v2284_v61 }
 0x53f   :  { %3626 = vmatprep.subr.bf16.mxu0 %v3625_v2 }
 0x542   :  { %3628 = vmatpush3.bf16.msra.mxu0 %v3625_v2  ;;  %v3713_v2 = vpack.c.bf16 %v2287_v1, %v2286_v63 }
 0x545   :  { %3183 = vmatmul.mubr.f32.vlgmr.msra.gmra.mrb[48].mxu0 %v1670_v4  ;;  %v2288_v4 = vld [vmem:[%s4849_s11 + $0x160] sm:$0xff]  ;;  %s3744_s11 = smov 96  }
 0x546   :  { %v3717_v5 = vpack.c.bf16 %v2289_v3, %v2288_v4 }
 0x618   :  { %v3184_v17 = vpop.f32.mrb[48].mxu0 }
 0x619   :  { %v1773_v18 = vadd.f32 %v3184_v17, %v2259_v16  ;;  %v1754_v19 = vpop.f32.mrb[49].mxu0 }
 0x61a   :  { %v1772_v20 = vadd.f32 %v2259_v16, %v1754_v19 }
 0x61b   :  { %v1775_v21 = vmax.f32 %v1773_v18, 0.0 }
 0x61c   :  { %v1774_v22 = vmax.f32 %v1772_v20, 0.0 }
 0x61d   :  { %1778 = vst [vmem:[#allocation9 + $0x9] sm:$0x1] %v1775_v21 }
 0x61e   :  { %1776 = vst [vmem:[#allocation9 + $0x1] sm:$0xef] %v1774_v22  }
 0x624   :  { %v1798_v27 = vld [vmem:[#allocation9 + $0x9] sm:$0x1] }
 0x625   :  { %v1797_v25 = vld [vmem:[#allocation9 + $0x1] sm:$0xff] }
 0x626   :  { %3217 = vmatprep.mubr.f32.mxu1 %v1797_v25  ;;  %v1779_v30 = vld [vmem:[#allocation9] sm:$0xff]  ;;  %v1780_v53 = vld [vmem:[#allocation9 + $0x8] sm:$0x1] }
 0x627   :  { %3218 = vmatmul.mubr.f32.vlgmr.msra.gmra.mrb[48].mxu1 %v1798_v27  ;;  %v1966_v56 = vld [vmem:[#allocation9 + $0x2] sm:$0xff] }
 0x628   :  { %3664 = vmatpush3.bf16.msra.mxu1 %v3661_v15  ;;  %3252 = vmatprep.mubr.f32.mxu1 %v1779_v30 }
 0x629   :  { %3666 = vmatprep.subr.bf16.mxu1 %v3665_v26 }
 0x62c   :  { %3668 = vmatpush3.bf16.msra.mxu1 %v3665_v26 }
 0x62d   :  { %3670 = vmatprep.subr.bf16.mxu1 %v3669_v31 }
 0x630   :  { %3672 = vmatpush3.bf16.msra.mxu1 %v3669_v31 }
 0x631   :  { %3674 = vmatprep.subr.bf16.mxu1 %v3673_v34 }
 0x634   :  { %3676 = vmatpush3.bf16.msra.mxu1 %v3673_v34 }
 0x635   :  { %3678 = vmatprep.subr.bf16.mxu1 %v3677_v37 }
 0x638   :  { %3680 = vmatpush3.bf16.msra.mxu1 %v3677_v37 }
 0x639   :  { %3682 = vmatprep.subr.bf16.mxu1 %v3681_v40 }
 0x63c   :  { %3684 = vmatpush3.bf16.msra.mxu1 %v3681_v40 }
 0x63d   :  { %3686 = vmatprep.subr.bf16.mxu1 %v3685_v43 }
 0x640   :  { %3688 = vmatpush3.bf16.msra.mxu1 %v3685_v43 }
 0x641   :  { %3690 = vmatprep.subr.bf16.mxu1 %v3689_v46 }
 0x644   :  { %3692 = vmatpush3.bf16.msra.mxu1 %v3689_v46 }
 0x645   :  { %3694 = vmatprep.subr.bf16.mxu1 %v3693_v49 }
 0x647   :  { %3253 = vmatmul.mubr.f32.vlgmr.msra.gmra.mrb[48].mxu1 %v1780_v53 }
 0x648   :  { %3696 = vmatpush3.bf16.msra.mxu1 %v3693_v49  ;;  %3287 = vmatprep.mubr.f32.mxu1 %v1966_v56 }
 0x649   :  { %3698 = vmatprep.subr.bf16.mxu1 %v3697_v52 }
 0x64c   :  { %3700 = vmatpush3.bf16.msra.mxu1 %v3697_v52 }
 0x64d   :  { %3702 = vmatprep.subr.bf16.mxu1 %v3701_v57 }
 0x650   :  { %3704 = vmatpush3.bf16.msra.mxu1 %v3701_v57 }
 0x651   :  { %3706 = vmatprep.subr.bf16.mxu1 %v3705_v60 }
 0x654   :  { %3708 = vmatpush3.bf16.msra.mxu1 %v3705_v60 }
 0x655   :  { %3710 = vmatprep.subr.bf16.mxu1 %v3709_v0 }
 0x658   :  { %3712 = vmatpush3.bf16.msra.mxu1 %v3709_v0 }
 0x659   :  { %3714 = vmatprep.subr.bf16.mxu1 %v3713_v2 }
 0x65c   :  { %3716 = vmatpush3.bf16.msra.mxu1 %v3713_v2 }
 0x65d   :  { %3718 = vmatprep.subr.bf16.mxu1 %v3717_v5 }
 0x660   :  { %3720 = vmatpush3.bf16.msra.mxu1 %v3717_v5 }
 0x661   :  { %3722 = vmatprep.subr.bf16.mxu1 %v3721_v8 }
 0x664   :  { %3724 = vmatpush3.bf16.msra.mxu1 %v3721_v8 }
 0x667   :  { %3288 = vmatmul.mubr.f32.vlgmr.msra.gmra.mrb[48].mxu1 %v1967_v9 }
 0x73a   :  { %v3289_v11 = vpop.f32.mrb[48].mxu1 }
 0x73b   :  { %v2070_v12 = vadd.f32 %v3289_v11, %v2292_v10  ;;  %v2051_v13 = vpop.f32.mrb[49].mxu1 }
 0x73c   :  { %v2069_v14 = vadd.f32 %v2292_v10, %v2051_v13 }
 0x73d   :  { %v2072_v15 = vmax.f32 %v2070_v12, 0.0 }
 0x73e   :  { %v2071_v16 = vmax.f32 %v2069_v14, 0.0 }
 0x73f   :  { %2075 = vst [vmem:[#allocation10 + $0x7] sm:$0x1] %v2072_v15 }
 0x740   :  { %2073 = vst [vmem:[#allocation10] sm:$0xf] %v2071_v16  ;;  %2074 = vst [vmem:[#allocation10 - $0x1] sm:$0xe0] %v2071_v16 }
 0x747   :  { %v2085_v17 = vld [vmem:[#allocation10 + $0x4] ss:$2 sm:$0x3]  ;;  %v2087_v18 = vld [vmem:[#allocation10 + $0x5] ss:$2 sm:$0x3] }
 0x748   :  { %v2088_v19 = vmax.f32 %v2085_v17, %v2087_v18  ;;  %v2076_v20 = vld [vmem:[#allocation10] ss:$2 sm:$0x3]  ;;  %v2078_v21 = vld [vmem:[#allocation10 + $0x1] ss:$2 sm:$0x3] }
 0x749   :  { %v2079_v22 = vmax.f32 %v2076_v20, %v2078_v21 }
 0x74a   :  { %2089 = vrot.lane.b32.xlu1 %v2088_v19, %s3744_s11 }
 0x74b   :  { %2080 = vrot.lane.b32.xlu0 %v2079_v22, %s3744_s11 }
 0x7bc   :  { %v2090_v23 = vpop.permute.xlu1 %2089 }
 0x7bd   :  { %v2091_v24 = vmax.f32 %v2088_v19, %v2090_v23  ;;  %v2081_v25 = vpop.permute.xlu0 %2080 }
 0x7be   :  { %v2082_v26 = vmax.f32 %v2079_v22, %v2081_v25 }
 0x7bf   :  { %2293 = vst [vmem:[%s4852_s13 + $0x2] sm:$0x3] %v2091_v24 }
 0x7c0   :  { %2083 = vst [vmem:[%s4852_s13] sm:$0x3] %v2082_v26 }

</bundles_post_ra>
